<compile_context>
chip_gen: v7x
topology: tpu7x:2x2x1
jax: 0.10.0
libtpu: 0.0.40
codegen_flags: <defaults>
</compile_context>

<pallas_src>
import functools

import numpy as np
import jax
import jax.numpy as jnp
from jax.experimental import pallas as pl
from jax.experimental.pallas import tpu as pltpu

VMEM = pltpu.MemorySpace.VMEM


# ---------------------------------------------------------------------------
# Fused FFC forward kernel (single invocation, no grid, 6 MXU matmuls)
# ---------------------------------------------------------------------------
def _ffc_fused_kernel(x_ref, dft_ref, invf_ref, invl_ref, w_ref, brow_ref, blf_ref,
                      oxl_ref, oxg_ref, *, B, out_cl, out_cg, half, HW, hw4,
                      off_wf, off_wc2):
    f32 = jnp.float32
    bf16 = jnp.bfloat16
    dot = lambda a, b: jnp.dot(a, b, preferred_element_type=f32)

    n1 = B * out_cl
    n2 = B * out_cg
    nbh = B * half

    # ---- stage 1: one fused block matmul ------------------------------------
    # rows [0:n1]        -> out_xl = convl2l(x_l) + convg2l(x_g)
    # rows [n1:n1+n2]    -> convl2g(x_l)                      (partial out_xg)
    # rows [n1+n2: ]     -> conv1(x_g) with BN scale pre-folded
    x = x_ref[...].astype(bf16)                                     # (B*C_in, HW)
    stage1 = dot(w_ref[0:n1 + n2 + nbh, :], x)                      # (40, HW) f32
    oxl_ref[...] = stage1[0:n1, :].astype(oxl_ref.dtype)
    xg_l2g = stage1[n1:n1 + n2, :]
    y = jnp.maximum(stage1[n1 + n2:, :] + brow_ref[0:nbh, :], 0.0)  # (nbh, HW)

    # ---- ONE consolidated forward-DFT matmul --------------------------------
    #   z = y @ [ dre | dim | G_lfu ]
    # G_lfu already folds: quadrant selection, 8x8 DFT, LFU 1x1 conv, LFU BN scale.
    z = dot(y.astype(bf16), dft_ref[...])                           # (nbh, 2*HW + half*2*hw4)

    # ---- global FourierUnit: channel mix on row-stacked [zr ; zi] -----------
    zri = jnp.concatenate([z[:, 0:HW], z[:, HW:2 * HW]], axis=0)    # (2*nbh, HW)
    wf = w_ref[off_wf:off_wf + 2 * nbh, 0:2 * nbh]                  # (2*nbh, 2*nbh)
    mix = jnp.maximum(dot(wf, zri.astype(bf16)) + brow_ref[nbh:3 * nbh, :], 0.0)
    # K-concatenated inverse DFT: fu = [mix_re | mix_im] @ [dre ; dim]
    mix_cols = jnp.concatenate([mix[0:nbh, :], mix[nbh:2 * nbh, :]], axis=1)  # (nbh, 2*HW)
    fu = dot(mix_cols.astype(bf16), invf_ref[...])                  # (nbh, HW)

    # ---- local FourierUnit (LFU) ---------------------------------------------
    # Only channel 0 of each batch feeds the LFU; its pre-mixed spectra sit in the
    # G_lfu column blocks of z.  Gather the (batch, out-channel) rows (replaces a
    # (B, half*2*hw4) -> (nbh, 2*hw4) reshape with explicit lane-aligned slices),
    # add the BN bias, ReLU, then one K-concatenated inverse DFT with the 2x2
    # spatial repeat folded into invl.
    lfu_in = jnp.concatenate(
        [z[b * half:b * half + 1,
           2 * HW + o * 2 * hw4: 2 * HW + (o + 1) * 2 * hw4]
         for b in range(B) for o in range(half)], axis=0)           # (nbh, 2*hw4)
    a = jnp.maximum(lfu_in + blf_ref[...], 0.0).astype(bf16)
    lfu = dot(a, invl_ref[...])                                     # (nbh, HW)

    # ---- residual sum + conv2, finish out_xg ---------------------------------
    s = (y + fu + lfu).astype(bf16)
    wc2 = w_ref[off_wc2:off_wc2 + n2, 0:nbh]                        # (n2, nbh)
    oxg_ref[...] = (xg_l2g + dot(wc2, s)).astype(oxg_ref.dtype)


def ffc_forward(x_l, x_g, consts):
    meta = consts['meta']
    B, in_cl, H, W = x_l.shape
    in_cg = x_g.shape[1]
    HW = H * W
    hw4 = (H // 2) * (W // 2)
    out_cl, out_cg, half = meta['out_cl'], meta['out_cg'], meta['half']

    # NCHW -> (B*C, H*W) is a free row-major reshape; one concat fuses l/g inputs.
    xin = jnp.concatenate([x_l.reshape(B * in_cl, HW),
                           x_g.reshape(B * in_cg, HW)], axis=0)

    kernel = functools.partial(
        _ffc_fused_kernel, B=B, out_cl=out_cl, out_cg=out_cg, half=half,
        HW=HW, hw4=hw4, off_wf=meta['off_wf'], off_wc2=meta['off_wc2'])

    oxl, oxg = pl.pallas_call(
        kernel,
        out_shape=(jax.ShapeDtypeStruct((B * out_cl, HW), jnp.float32),
                   jax.ShapeDtypeStruct((B * out_cg, HW), jnp.float32)),
        in_specs=[pl.BlockSpec(memory_space=VMEM)] * 7,
        out_specs=(pl.BlockSpec(memory_space=VMEM),
                   pl.BlockSpec(memory_space=VMEM)),
    )(xin, consts['dft_cat'], consts['inv_fu'], consts['inv_lfu'],
      consts['wpack'], consts['brow'], consts['blfA'])

    return oxl.reshape(B, out_cl, H, W), oxg.reshape(B, out_cg, H, W)


# ---------------------------------------------------------------------------
# Host-side constant construction (block weights, folded DFT matrices)
# ---------------------------------------------------------------------------
def _dft_mats(n):
    k = np.arange(n)
    ang = -2.0 * np.pi * np.outer(k, k) / n
    s = 1.0 / np.sqrt(n)
    return np.cos(ang) * s, np.sin(ang) * s


def _dft2_kron(h, w):
    """Ortho-normalized 2-D DFT matrix kron(F_h, F_w) -> (real, imag), (h*w, h*w)."""
    fhr, fhi = _dft_mats(h)
    fwr, fwi = _dft_mats(w)
    dre = np.kron(fhr, fwr) - np.kron(fhi, fwi)
    dim = np.kron(fhr, fwi) + np.kron(fhi, fwr)
    return dre, dim


def _round_up(v, m=16):
    return ((v + m - 1) // m) * m


def build_ffc_constants(p, B, in_cl, in_cg, out_cl, out_cg, H, W):
    half = out_cg // 2
    assert half == 4, "LFU construction assumes out_cg // 2 == 4 (spec config)."
    HW = H * W
    h2, w2 = H // 2, W // 2
    hw4 = h2 * w2
    n1, n2, nbh = B * out_cl, B * out_cg, B * half
    C_in = in_cl + in_cg

    # ---- full-size and quadrant DFT matrices ---------------------------------
    dre, dim = _dft2_kron(H, W)                       # (HW, HW)
    dre8, dim8 = _dft2_kron(h2, w2)                   # (hw4, hw4)
    quads = [(0, 0), (1, 0), (0, 1), (1, 1)]          # torch split/cat: TL, BL, TR, BR
    dsre = np.zeros((4, HW, hw4))
    dsim = np.zeros((4, HW, hw4))
    for q, (qh, qw) in enumerate(quads):
        sel = np.zeros((HW, hw4))
        for hh in range(h2):
            for ww in range(w2):
                sel[(qh * h2 + hh) * W + (qw * w2 + ww), hh * w2 + ww] = 1.0
        dsre[q] = sel @ dre8
        dsim[q] = sel @ dim8
    # inverse 8x8 DFT with the 2x2 spatial repeat folded in
    col = ((np.arange(H)[:, None] % h2) * w2 + (np.arange(W)[None, :] % w2)).reshape(-1)
    dret, dimt = dre8[:, col], dim8[:, col]           # (hw4, HW)

    # ---- LFU: fold quadrant DFTs + 1x1 conv + BN scale into G_lfu ------------
    wlr = np.asarray(p['w_lfu_r'], np.float64)        # (2*half, 4)  real-input cols
    wli = np.asarray(p['w_lfu_i'], np.float64)        # (2*half, 4)  imag-input cols
    slf = np.asarray(p['s_lfu'], np.float64)
    blf = np.asarray(p['b_lfu'], np.float64)
    Gcat = np.zeros((HW, half * 2 * hw4))
    for o in range(half):
        for part, m in ((0, o), (1, half + o)):       # (real-out, imag-out) per channel
            Gm = sum(wlr[m, q] * dsre[q] + wli[m, q] * dsim[q] for q in range(4))
            Gcat[:, (2 * o + part) * hw4:(2 * o + part + 1) * hw4] = slf[m] * Gm

    dft_cat = np.concatenate([dre, dim, Gcat], axis=1)   # (HW, 2*HW + half*2*hw4)
    inv_fu = np.concatenate([dre, dim], axis=0)          # (2*HW, HW)
    inv_lfu = np.concatenate([dret, dimt], axis=0)       # (2*hw4, HW)

    # ---- stage-1 block weight (conv1 rows pre-scaled by its BN scale) --------
    w_l2l = np.asarray(p['w_l2l'], np.float64)
    w_g2l = np.asarray(p['w_g2l'], np.float64)
    w_l2g = np.asarray(p['w_l2g'], np.float64)
    w_c1 = np.asarray(p['w_c1'], np.float64)
    s_c1 = np.asarray(p['s_c1'], np.float64)
    b_c1 = np.asarray(p['b_c1'], np.float64)
    nr1 = n1 + n2 + nbh
    W1 = np.zeros((nr1, B * C_in))
    og = B * in_cl                                      # offset of x_g rows in xin
    for b in range(B):
        for o in range(out_cl):
            W1[b * out_cl + o, b * in_cl:(b + 1) * in_cl] = w_l2l[:, o]
            W1[b * out_cl + o, og + b * in_cg:og + (b + 1) * in_cg] = w_g2l[:, o]
        for o in range(out_cg):
            W1[n1 + b * out_cg + o, b * in_cl:(b + 1) * in_cl] = w_l2g[:, o]
        for c in range(half):
            W1[n1 + n2 + b * half + c, og + b * in_cg:og + (b + 1) * in_cg] = s_c1[c] * w_c1[:, c]

    # ---- global FourierUnit mix (block-diag per batch, BN scale folded) ------
    wfr = np.asarray(p['w_fu_r'], np.float64)
    wfi = np.asarray(p['w_fu_i'], np.float64)
    sfu = np.asarray(p['s_fu'], np.float64)
    bfu = np.asarray(p['b_fu'], np.float64)
    Wf = np.zeros((2 * nbh, 2 * nbh))
    for po in range(2):
        for b in range(B):
            for co in range(half):
                orow = po * nbh + b * half + co
                m = po * half + co
                for ci in range(half):
                    Wf[orow, 0 * nbh + b * half + ci] = sfu[m] * wfr[m, ci]
                    Wf[orow, 1 * nbh + b * half + ci] = sfu[m] * wfi[m, ci]

    # ---- conv2 block weight ---------------------------------------------------
    w_c2 = np.asarray(p['w_c2'], np.float64)            # (half, out_cg)
    Wc2 = np.zeros((n2, nbh))
    for b in range(B):
        for o in range(out_cg):
            for c in range(half):
                Wc2[b * out_cg + o, b * half + c] = w_c2[c, o]

    # ---- pack the small matmul weights into one bf16 buffer ------------------
    off_wf = _round_up(nr1)
    off_wc2 = off_wf + _round_up(2 * nbh)
    wrows = off_wc2 + _round_up(n2)
    wcols = max(B * C_in, 2 * nbh, nbh)
    wpack = np.zeros((wrows, wcols))
    wpack[0:nr1, 0:B * C_in] = W1
    wpack[off_wf:off_wf + 2 * nbh, 0:2 * nbh] = Wf
    wpack[off_wc2:off_wc2 + n2, 0:nbh] = Wc2

    # ---- additive bias tables (BN scales already folded into weights) --------
    brow = np.zeros((3 * nbh, 1))
    for b in range(B):
        for c in range(half):
            brow[b * half + c, 0] = b_c1[c]
    for po in range(2):
        for b in range(B):
            for co in range(half):
                brow[nbh + po * nbh + b * half + co, 0] = bfu[po * half + co]
    blfA = np.zeros((nbh, 2 * hw4))
    for b in range(B):
        for o in range(half):
            blfA[b * half + o, 0:hw4] = blf[o]
            blfA[b * half + o, hw4:] = blf[half + o]

    consts = {
        'dft_cat': jnp.asarray(dft_cat, jnp.bfloat16),
        'inv_fu': jnp.asarray(inv_fu, jnp.bfloat16),
        'inv_lfu': jnp.asarray(inv_lfu, jnp.bfloat16),
        'wpack': jnp.asarray(wpack, jnp.bfloat16),
        'brow': jnp.asarray(brow, jnp.float32),
        'blfA': jnp.asarray(blfA, jnp.float32),
        'meta': dict(out_cl=out_cl, out_cg=out_cg, half=half,
                     off_wf=off_wf, off_wc2=off_wc2),
    }
    return consts


# ---------------------------------------------------------------------------
# Parameter init (matches the PyTorch module's config; BN in eval mode)
# ---------------------------------------------------------------------------
def init_ffc_params(key, in_channels=16, out_channels=16, ratio_gin=0.5, ratio_gout=0.5):
    in_cg = int(in_channels * ratio_gin)
    in_cl = in_channels - in_cg
    out_cg = int(out_channels * ratio_gout)
    out_cl = out_channels - out_cg
    ks = jax.random.split(key, 8)

    def conv_w_io(k, cin, cout):  # [in, out] layout
        bound = 1.0 / np.sqrt(cin)
        return jax.random.uniform(k, (cin, cout), jnp.float32, -bound, bound)

    eps = 1e-5

    def bn_eval(c):  # init-time running stats: mean=0, var=1, gamma=1, beta=0
        scale = jnp.full((c,), 1.0 / np.sqrt(1.0 + eps), jnp.float32)
        bias = jnp.zeros((c,), jnp.float32)
        return scale, bias

    def fu_w(k, c):  # FourierUnit conv weight (2c, 2c) [out, in]; split real/imag inputs
        bound = 1.0 / np.sqrt(2 * c)
        w = jax.random.uniform(k, (2 * c, 2 * c), jnp.float32, -bound, bound)
        return w[:, :c], w[:, c:]

    p = {}
    p['w_l2l'] = conv_w_io(ks[0], in_cl, out_cl)
    p['w_g2l'] = conv_w_io(ks[1], in_cg, out_cl)
    p['w_l2g'] = conv_w_io(ks[2], in_cl, out_cg)
    half = out_cg // 2
    p['w_c1'] = conv_w_io(ks[3], in_cg, half)
    p['s_c1'], p['b_c1'] = bn_eval(half)
    p['w_fu_r'], p['w_fu_i'] = fu_w(ks[4], half)
    p['s_fu'], p['b_fu'] = bn_eval(2 * half)
    p['w_lfu_r'], p['w_lfu_i'] = fu_w(ks[5], half)
    p['s_lfu'], p['b_lfu'] = bn_eval(2 * half)
    p['w_c2'] = conv_w_io(ks[6], half, out_cg)
    return p


# ---------------------------------------------------------------------------
# Pure-JAX reference (uses jnp.fft) for validation
# ---------------------------------------------------------------------------
def _conv1x1_ref(x, w_io):
    return jnp.einsum('bihw,io->bohw', x, w_io)


def _fourier_unit_ref(x, wr, wi, scale, bias):
    f = jnp.fft.fft2(x, norm='ortho')
    cat = jnp.concatenate([f.real, f.imag], axis=1)
    w = jnp.concatenate([wr, wi], axis=1)       # (2C, 2C) [out, in]
    y = jnp.einsum('oi,bihw->bohw', w, cat)
    y = jnp.maximum(y * scale[None, :, None, None] + bias[None, :, None, None], 0.0)
    C = x.shape[1]
    return jnp.fft.ifft2(y[:, :C] + 1j * y[:, C:], norm='ortho').real


def ffc_ref(x_l, x_g, p):
    out_xl = _conv1x1_ref(x_l, p['w_l2l']) + _conv1x1_ref(x_g, p['w_g2l'])
    y = _conv1x1_ref(x_g, p['w_c1'])
    y = jnp.maximum(y * p['s_c1'][None, :, None, None] + p['b_c1'][None, :, None, None], 0.0)
    fu = _fourier_unit_ref(y, p['w_fu_r'], p['w_fu_i'], p['s_fu'], p['b_fu'])
    half = y.shape[1]
    xs = y[:, :half // 4]
    xs = jnp.concatenate(jnp.split(xs, 2, axis=2), axis=1)
    xs = jnp.concatenate(jnp.split(xs, 2, axis=3), axis=1)
    xs = _fourier_unit_ref(xs, p['w_lfu_r'], p['w_lfu_i'], p['s_lfu'], p['b_lfu'])
    xs = jnp.tile(xs, (1, 1, 2, 2))
    s = y + fu + xs
    out_xg = _conv1x1_ref(x_l, p['w_l2g']) + _conv1x1_ref(s, p['w_c2'])
    return out_xl, out_xg


# ---------------------------------------------------------------------------
if __name__ == "__main__":
    key = jax.random.PRNGKey(0)
    k_x, k_p = jax.random.split(key)
    B, C, H, W = 2, 16, 16, 16
    x = jax.random.normal(k_x, (B, C, H, W), jnp.float32)
    x_l, x_g = x[:, :C // 2], x[:, C // 2:]     # FFC tuple input (local, global)

    params = init_ffc_params(k_p, in_channels=C, out_channels=C)
    consts = build_ffc_constants(params, B, in_cl=C // 2, in_cg=C // 2,
                                 out_cl=C // 2, out_cg=C // 2, H=H, W=W)

    out_xl, out_xg = ffc_forward(x_l, x_g, consts)
    jax.block_until_ready((out_xl, out_xg))

    ref_xl, ref_xg = ffc_ref(x_l, x_g, params)
    np.testing.assert_allclose(np.asarray(out_xl), np.asarray(ref_xl), atol=5e-2, rtol=5e-2)
    np.testing.assert_allclose(np.asarray(out_xg), np.asarray(ref_xg), atol=5e-2, rtol=5e-2)

    print("KERNEL_OK")
</pallas_src>

<mosaic_0001>
module attributes {stable_mosaic.version = 11 : i64} {
  func.func @_ffc_fused_kernel(%arg0: memref<32x256xf32, #tpu.memory_space<vmem>>, %arg1: memref<256x1024xbf16, #tpu.memory_space<vmem>>, %arg2: memref<512x256xbf16, #tpu.memory_space<vmem>>, %arg3: memref<128x256xbf16, #tpu.memory_space<vmem>>, %arg4: memref<80x32xbf16, #tpu.memory_space<vmem>>, %arg5: memref<24x1xf32, #tpu.memory_space<vmem>>, %arg6: memref<8x128xf32, #tpu.memory_space<vmem>>, %arg7: memref<16x256xf32, #tpu.memory_space<vmem>>, %arg8: memref<16x256xf32, #tpu.memory_space<vmem>>) attributes {dimension_semantics = [], scalar_prefetch = 0 : i64, scratch_operands = 0 : i64, tpu.core_type = #tpu.core_type<tc>} {
    %c0 = arith.constant 0 : index
    %c0_0 = arith.constant 0 : index
    %0 = vector.load %arg0[%c0, %c0_0] : memref<32x256xf32, #tpu.memory_space<vmem>>, vector<32x256xf32>
    %1 = arith.truncf %0 : vector<32x256xf32> to vector<32x256xbf16>
    %c0_1 = arith.constant 0 : index
    %c0_2 = arith.constant 0 : index
    %2 = vector.load %arg4[%c0_1, %c0_2] : memref<80x32xbf16, #tpu.memory_space<vmem>>, vector<40x32xbf16>
    %cst = arith.constant dense<0.000000e+00> : vector<40x256xf32>
    %3 = tpu.matmul %2, %1, %cst {dimension_numbers = #tpu.dot_dimension_numbers<[1], [0], [0], [1], [0, 0, 1, 1], [], []>} : vector<40x32xbf16>, vector<32x256xbf16>, vector<40x256xf32> -> vector<40x256xf32>
    %4 = vector.extract_strided_slice %3 {offsets = [0, 0], sizes = [16, 256], strides = [1, 1]} : vector<40x256xf32> to vector<16x256xf32>
    %c0_3 = arith.constant 0 : index
    %c0_4 = arith.constant 0 : index
    %5 = vector.load %arg7[%c0_3, %c0_4] : memref<16x256xf32, #tpu.memory_space<vmem>>, vector<16x256xf32>
    tpu.vector_store %arg7[%c0_3, %c0_4], %4 {strides = array<i32>} : memref<16x256xf32, #tpu.memory_space<vmem>>, vector<16x256xf32>,
    %6 = vector.extract_strided_slice %3 {offsets = [16, 0], sizes = [16, 256], strides = [1, 1]} : vector<40x256xf32> to vector<16x256xf32>
    %7 = vector.extract_strided_slice %3 {offsets = [32, 0], sizes = [8, 256], strides = [1, 1]} : vector<40x256xf32> to vector<8x256xf32>
    %c0_5 = arith.constant 0 : index
    %c0_6 = arith.constant 0 : index
    %8 = vector.load %arg5[%c0_5, %c0_6] : memref<24x1xf32, #tpu.memory_space<vmem>>, vector<8x1xf32>
    %9 = vector.broadcast %8 : vector<8x1xf32> to vector<8x256xf32>
    %10 = arith.addf %7, %9 : vector<8x256xf32>
    %cst_7 = arith.constant 0.000000e+00 : f32
    %11 = vector.broadcast %cst_7 : f32 to vector<8x256xf32>
    %12 = arith.maximumf %10, %11 : vector<8x256xf32>
    %13 = arith.truncf %12 : vector<8x256xf32> to vector<8x256xbf16>
    %c0_8 = arith.constant 0 : index
    %c0_9 = arith.constant 0 : index
    %14 = vector.load %arg1[%c0_8, %c0_9] : memref<256x1024xbf16, #tpu.memory_space<vmem>>, vector<256x1024xbf16>
    %cst_10 = arith.constant dense<0.000000e+00> : vector<8x1024xf32>
    %15 = tpu.matmul %13, %14, %cst_10 {dimension_numbers = #tpu.dot_dimension_numbers<[1], [0], [0], [1], [0, 0, 1, 1], [], []>} : vector<8x256xbf16>, vector<256x1024xbf16>, vector<8x1024xf32> -> vector<8x1024xf32>
    %16 = vector.extract_strided_slice %15 {offsets = [0, 0], sizes = [8, 256], strides = [1, 1]} : vector<8x1024xf32> to vector<8x256xf32>
    %17 = vector.extract_strided_slice %15 {offsets = [0, 256], sizes = [8, 256], strides = [1, 1]} : vector<8x1024xf32> to vector<8x256xf32>
    %18 = tpu.concatenate %16, %17 in 0 : vector<8x256xf32>, vector<8x256xf32> -> vector<16x256xf32>
    %c48 = arith.constant 48 : index
    %c0_11 = arith.constant 0 : index
    %19 = vector.load %arg4[%c48, %c0_11] : memref<80x32xbf16, #tpu.memory_space<vmem>>, vector<16x16xbf16>
    %20 = arith.truncf %18 : vector<16x256xf32> to vector<16x256xbf16>
    %cst_12 = arith.constant dense<0.000000e+00> : vector<16x256xf32>
    %21 = tpu.matmul %19, %20, %cst_12 {dimension_numbers = #tpu.dot_dimension_numbers<[1], [0], [0], [1], [0, 0, 1, 1], [], []>} : vector<16x16xbf16>, vector<16x256xbf16>, vector<16x256xf32> -> vector<16x256xf32>
    %c8 = arith.constant 8 : index
    %c0_13 = arith.constant 0 : index
    %22 = vector.load %arg5[%c8, %c0_13] : memref<24x1xf32, #tpu.memory_space<vmem>>, vector<16x1xf32>
    %23 = vector.broadcast %22 : vector<16x1xf32> to vector<16x256xf32>
    %24 = arith.addf %21, %23 : vector<16x256xf32>
    %cst_14 = arith.constant 0.000000e+00 : f32
    %25 = vector.broadcast %cst_14 : f32 to vector<16x256xf32>
    %26 = arith.maximumf %24, %25 : vector<16x256xf32>
    %27 = vector.extract_strided_slice %26 {offsets = [0, 0], sizes = [8, 256], strides = [1, 1]} : vector<16x256xf32> to vector<8x256xf32>
    %28 = vector.extract_strided_slice %26 {offsets = [8, 0], sizes = [8, 256], strides = [1, 1]} : vector<16x256xf32> to vector<8x256xf32>
    %29 = tpu.concatenate %27, %28 in 1 : vector<8x256xf32>, vector<8x256xf32> -> vector<8x512xf32>
    %30 = arith.truncf %29 : vector<8x512xf32> to vector<8x512xbf16>
    %c0_15 = arith.constant 0 : index
    %c0_16 = arith.constant 0 : index
    %31 = vector.load %arg2[%c0_15, %c0_16] : memref<512x256xbf16, #tpu.memory_space<vmem>>, vector<512x256xbf16>
    %cst_17 = arith.constant dense<0.000000e+00> : vector<8x256xf32>
    %32 = tpu.matmul %30, %31, %cst_17 {dimension_numbers = #tpu.dot_dimension_numbers<[1], [0], [0], [1], [0, 0, 1, 1], [], []>} : vector<8x512xbf16>, vector<512x256xbf16>, vector<8x256xf32> -> vector<8x256xf32>
    %33 = vector.extract_strided_slice %15 {offsets = [0, 512], sizes = [1, 128], strides = [1, 1]} : vector<8x1024xf32> to vector<1x128xf32>
    %34 = vector.extract_strided_slice %15 {offsets = [0, 640], sizes = [1, 128], strides = [1, 1]} : vector<8x1024xf32> to vector<1x128xf32>
    %35 = vector.extract_strided_slice %15 {offsets = [0, 768], sizes = [1, 128], strides = [1, 1]} : vector<8x1024xf32> to vector<1x128xf32>
    %36 = vector.extract_strided_slice %15 {offsets = [0, 896], sizes = [1, 128], strides = [1, 1]} : vector<8x1024xf32> to vector<1x128xf32>
    %37 = vector.extract_strided_slice %15 {offsets = [4, 512], sizes = [1, 128], strides = [1, 1]} : vector<8x1024xf32> to vector<1x128xf32>
    %38 = vector.extract_strided_slice %15 {offsets = [4, 640], sizes = [1, 128], strides = [1, 1]} : vector<8x1024xf32> to vector<1x128xf32>
    %39 = vector.extract_strided_slice %15 {offsets = [4, 768], sizes = [1, 128], strides = [1, 1]} : vector<8x1024xf32> to vector<1x128xf32>
    %40 = vector.extract_strided_slice %15 {offsets = [4, 896], sizes = [1, 128], strides = [1, 1]} : vector<8x1024xf32> to vector<1x128xf32>
    %41 = tpu.concatenate %33, %34, %35, %36, %37, %38, %39, %40 in 0 : vector<1x128xf32>, vector<1x128xf32>, vector<1x128xf32>, vector<1x128xf32>, vector<1x128xf32>, vector<1x128xf32>, vector<1x128xf32>, vector<1x128xf32> -> vector<8x128xf32>
    %c0_18 = arith.constant 0 : index
    %c0_19 = arith.constant 0 : index
    %42 = vector.load %arg6[%c0_18, %c0_19] : memref<8x128xf32, #tpu.memory_space<vmem>>, vector<8x128xf32>
    %43 = arith.addf %41, %42 : vector<8x128xf32>
    %cst_20 = arith.constant 0.000000e+00 : f32
    %44 = vector.broadcast %cst_20 : f32 to vector<8x128xf32>
    %45 = arith.maximumf %43, %44 : vector<8x128xf32>
    %46 = arith.truncf %45 : vector<8x128xf32> to vector<8x128xbf16>
    %c0_21 = arith.constant 0 : index
    %c0_22 = arith.constant 0 : index
    %47 = vector.load %arg3[%c0_21, %c0_22] : memref<128x256xbf16, #tpu.memory_space<vmem>>, vector<128x256xbf16>
    %cst_23 = arith.constant dense<0.000000e+00> : vector<8x256xf32>
    %48 = tpu.matmul %46, %47, %cst_23 {dimension_numbers = #tpu.dot_dimension_numbers<[1], [0], [0], [1], [0, 0, 1, 1], [], []>} : vector<8x128xbf16>, vector<128x256xbf16>, vector<8x256xf32> -> vector<8x256xf32>
    %49 = arith.addf %12, %32 : vector<8x256xf32>
    %50 = arith.addf %49, %48 : vector<8x256xf32>
    %51 = arith.truncf %50 : vector<8x256xf32> to vector<8x256xbf16>
    %c64 = arith.constant 64 : index
    %c0_24 = arith.constant 0 : index
    %52 = vector.load %arg4[%c64, %c0_24] : memref<80x32xbf16, #tpu.memory_space<vmem>>, vector<16x8xbf16>
    %cst_25 = arith.constant dense<0.000000e+00> : vector<16x256xf32>
    %53 = tpu.matmul %52, %51, %cst_25 {dimension_numbers = #tpu.dot_dimension_numbers<[1], [0], [0], [1], [0, 0, 1, 1], [], []>} : vector<16x8xbf16>, vector<8x256xbf16>, vector<16x256xf32> -> vector<16x256xf32>
    %54 = arith.addf %6, %53 : vector<16x256xf32>
    %c0_26 = arith.constant 0 : index
    %c0_27 = arith.constant 0 : index
    %55 = vector.load %arg8[%c0_26, %c0_27] : memref<16x256xf32, #tpu.memory_space<vmem>>, vector<16x256xf32>
    tpu.vector_store %arg8[%c0_26, %c0_27], %54 {strides = array<i32>} : memref<16x256xf32, #tpu.memory_space<vmem>>, vector<16x256xf32>,
    return
  }
}

</mosaic_0001>

<bundles_post_ra>
// kernel: tpu_custom_call.1
= control target key start
LH: loop header
LB: loop body
LE: loop exit
PB: predicated region body
PF: predicated region fallthrough
CT: control target
= control target key end

     0   :  { %14 = vsyncpa [#allocation3], 0  ;;  %s2657_s0 = inlined_call_operand.vmem [shape: f32[32,256], index: 0, kind: input, shape index: {}]   ;;  %s2658_s1 = inlined_call_operand.hbm [shape: bf16[256,1024], index: 1, kind: input, shape index: {}]   ;;  %s2659_s2 = inlined_call_operand.hbm [shape: bf16[512,256], index: 2, kind: input, shape index: {}]   ;;  %s2660_s3 = inlined_call_operand.hbm [shape: bf16[128,256], index: 3, kind: input, shape index: {}]   ;;  %s2661_s4 = inlined_call_operand.vmem [shape: bf16[80,32], index: 4, kind: input, shape index: {}]   ;;  %s2662_s5 = inlined_call_operand.vmem [shape: f32[24,1], index: 5, kind: input, shape index: {}]   ;;  %s2663_s6 = inlined_call_operand.vmem [shape: f32[8,128], index: 6, kind: input, shape index: {}]   ;;  %s2664_s7 = inlined_call_operand.hbm [shape: f32[16,256], index: 7, kind: output, shape index: {0}]   ;;  %s2665_s8 = inlined_call_operand.hbm [shape: f32[16,256], index: 8, kind: output, shape index: {1}]  }
   0x1   :  { %15 = vsyncpa [#allocation6], 0 }
   0x2   :  { %16 = vsyncpa [#allocation4], 0 }
   0x3   :  { %17 = vsyncpa [#allocation10], 0  ;;  %s2425_s27 = smov [#allocation5]   ;;  %s2307_s9 = scalar_lea.hbm %s2659_s2, 8192 }
   0x4   :  { %s37_s28 = sshll.u32 %s2425_s27, 4  ;;  %p2308_p0 = scmp.ne.s32.totalorder %s2659_s2, %s2307_s9  ;;  %s38_s28 = int_to_ptr.vmem [resolvable:$true] %s37_s28 }
   0x5   :  { %p2311_p1 = scmp.lt.u32.totalorder %s2307_s9, %s2659_s2 }
   0x7   :  { %p2313_p2 = pnand %p2311_p1, %p2308_p0 }
   0x9   :  { %2316 = shalt.err (!%p2313_p2)
}
   0xa   :  { %s2317_s14 = scalar_lea.vmem %s38_s28, 8192  ;;  %p2322_p4 = scmp.lt.s32.totalorder %s38_s28, %s38_s28 }
   0xb   :  { %p2318_p3 = scmp.ne.s32.totalorder %s38_s28, %s2317_s14  ;;  %p2323_p5 = scmp.lt.s32.totalorder %s2317_s14, %s2317_s14 }
   0xd   :  { %p2324_p6 = por %p2323_p5, %p2322_p4 }
   0xf   :  { %p2325_p7 = pnand %p2324_p6, %p2318_p3 }
  0x11   :  { %2328 = shalt.err (!%p2325_p7)
}
  0x12   :  { %s2426_s15 = smov 128   ;;  %s2427_s16 = smov 8  }
  0x13   :  { %43 = dma.hbm_to_vmem [thread:$0]  %s2659_s2, 8192, %s38_s28, [#allocation6], %s2426_s15, %s2426_s15, %s2427_s16  }
  0x14   :  { %s2428_s19 = smov [#allocation2]   ;;  %s2329_s23 = scalar_lea.hbm %s2658_s1, 16384 }
  0x15   :  { %s25_s20 = sshll.u32 %s2428_s19, 4  ;;  %p2330_p8 = scmp.ne.s32.totalorder %s2658_s1, %s2329_s23  ;;  %s26_s20 = int_to_ptr.vmem [resolvable:$true] %s25_s20 }
  0x16   :  { %p2333_p9 = scmp.lt.u32.totalorder %s2329_s23, %s2658_s1 }
  0x18   :  { %p2335_p10 = pnand %p2333_p9, %p2330_p8 }
  0x1a   :  { %2338 = shalt.err (!%p2335_p10)
}
  0x1b   :  { %s2339_s29 = scalar_lea.vmem %s26_s20, 16384  ;;  %p2344_p12 = scmp.lt.s32.totalorder %s26_s20, %s26_s20 }
  0x1c   :  { %p2340_p11 = scmp.ne.s32.totalorder %s26_s20, %s2339_s29  ;;  %p2345_p13 = scmp.lt.s32.totalorder %s2339_s29, %s2339_s29 }
  0x1e   :  { %p2346_p0 = por %p2345_p13, %p2344_p12 }
  0x20   :  { %p2347_p1 = pnand %p2346_p0, %p2340_p11 }
  0x22   :  { %2350 = shalt.err (!%p2347_p1)
}
  0x23   :  { %s2429_s2 = smov 512   ;;  %s2430_s28 = smov 32  }
  0x24   :  { %31 = dma.hbm_to_vmem [thread:$0]  %s2658_s1, 16384, %s26_s20, [#allocation3], %s2429_s2, %s2429_s2, %s2430_s28  }
  0x25   :  { %s2431_s10 = smov [#allocation7]   ;;  %s2351_s14 = scalar_lea.hbm %s2660_s3, 2048 }
  0x26   :  { %s49_s11 = sshll.u32 %s2431_s10, 4  ;;  %p2352_p2 = scmp.ne.s32.totalorder %s2660_s3, %s2351_s14  ;;  %s50_s11 = int_to_ptr.vmem [resolvable:$true] %s49_s11 }
  0x27   :  { %p2355_p3 = scmp.lt.u32.totalorder %s2351_s14, %s2660_s3 }
  0x29   :  { %p2357_p4 = pnand %p2355_p3, %p2352_p2 }
  0x2b   :  { %2360 = shalt.err (!%p2357_p4)
}
  0x2c   :  { %s2361_s22 = scalar_lea.vmem %s50_s11, 2048  ;;  %p2366_p6 = scmp.lt.s32.totalorder %s50_s11, %s50_s11 }
  0x2d   :  { %p2362_p5 = scmp.ne.s32.totalorder %s50_s11, %s2361_s22  ;;  %p2367_p7 = scmp.lt.s32.totalorder %s2361_s22, %s2361_s22 }
  0x2f   :  { %p2368_p8 = por %p2367_p7, %p2366_p6 }
  0x31   :  { %p2369_p9 = pnand %p2368_p8, %p2362_p5 }
  0x33   :  { %2372 = shalt.err (!%p2369_p9)
}
  0x34   :  { %55 = dma.hbm_to_vmem [thread:$0]  %s2660_s3, 2048, %s50_s11, [#allocation6], %s2426_s15, %s2426_s15, %s2427_s16  }
  0x35   :  { %2417 = dma.done.wait [#allocation3], 16384  }
  0x36   :  { %2418 = vsyncadd [#allocation3], 4294950912 }
  0x37   :  { %2419 = dma.done.wait [#allocation6], 10240  }
  0x38   :  { %2420 = vsyncadd [#allocation6], 4294957056  ;;  %v2432_v0 = vmov 0   ;;  %v73_v1 = vld [vmem:[%s2657_s0 + $0x8] sm:$0xff]  ;;  %v75_v2 = vld [vmem:[%s2657_s0 + $0x18] sm:$0xff]  ;;  %vm102_vm0 = vcmask 261120  }
  0x39   :  { %144 = vmatprep.mubr.bf16.mxu1 %v2432_v0  ;;  %2180 = vset.pattern.permute.xlu0 %v2432_v0  ;;  %v72_v3 = vld [vmem:[%s2657_s0] sm:$0xff]  ;;  %v81_v4 = vpack.c.bf16 %v75_v2, %v73_v1  ;;  %v74_v5 = vld [vmem:[%s2657_s0 + $0x10] sm:$0xff]  ;;  %v77_v6 = vld [vmem:[%s2657_s0 + $0x28] sm:$0xff]  ;;  %vm1142_vm1 = vcmask 130048   ;;  %vm1672_vm2 = vcmask 1040384   ;;  %vm1674_vm3 = vcmask 1041408  }
  0x3a   :  { %2181 = vset.pattern.permute.xlu1 %v2432_v0  ;;  %v79_v7 = vld [vmem:[%s2657_s0 + $0x38] sm:$0xff]  ;;  %v80_v8 = vpack.c.bf16 %v74_v5, %v72_v3  ;;  %v76_v10 = vld [vmem:[%s2657_s0 + $0x20] sm:$0xff]  ;;  %v78_v11 = vld [vmem:[%s2657_s0 + $0x30] sm:$0xff]  ;;  %vm1676_vm4 = vcmask 1042432   ;;  %vm1678_vm5 = vcmask 1043456   ;;  %vm1680_vm6 = vcmask 1044480  }
  0x3b   :  { %v83_v9 = vpack.c.bf16 %v79_v7, %v77_v6  ;;  %112 = vmatprep.subr.bf16.mxu1 %v81_v4  ;;  %v82_v12 = vpack.c.bf16 %v78_v11, %v76_v10  ;;  %v2182_v13 = vld [vmem:[%s2661_s4] sm:$0xff]   ;;  %v1125_v15 = vld [vmem:[%s2662_s5 + $0x8] sm:$0xff]  ;;  %v192_v18 = vld [vmem:[#allocation2 + $0x18] sm:$0xff]  ;;  %vm1682_vm7 = vcmask 1045504   ;;  %vm1684_vm8 = vcmask 1046528   ;;  %s2433_s16 = smov [#allocation8]  }
  0x3c   :  { %113 = vmatpush1.bf16.msra.mxu1 %v80_v8  ;;  %v177_v14 = vld [vmem:[%s2662_s5] sm:$0xff]  ;;  %v196_v20 = vld [vmem:[#allocation2 + $0x38] sm:$0xff]  ;;  %v2183_v42 = vld [vmem:[%s2661_s4 + $0x8] sm:$0xff]   ;;  %vm1840_vm9 = vcmask 64512   ;;  %s1906_s27 = sshll.u32 %s2433_s16, 4  ;;  %s1907_s27 = int_to_ptr.vmem [resolvable:$true] %s1906_s27 }
  0x3d   :  { %114 = vmatprep.subr.bf16.mxu1 %v83_v9  ;;  %180 = vperm.xlu0 %2180, %v177_v14   ;;  %v189_v16 = vld [vmem:[#allocation2] sm:$0xff]  ;;  %v1948_v24 = vcombine.high %v192_v18, %v196_v20  ;;  %v1947_v25 = vcombine.low %v192_v18, %v196_v20  ;;  %v200_v26 = vld [vmem:[#allocation2 + $0x58] sm:$0xff]  ;;  %v2184_v58 = vld [vmem:[%s2661_s4 + $0x10] ss:$0 sps:$4 sm:$0xff]   ;;  %s2373_s29 = scalar_lea.vmem %s1907_s27, 512  ;;  %p2378_p11 = scmp.lt.s32.totalorder %s1907_s27, %s1907_s27 }
  0x3e   :  { %v193_v17 = vld [vmem:[#allocation2 + $0x20] sm:$0xff]  ;;  %v204_v27 = vld [vmem:[#allocation2 + $0x78] sm:$0xff]  ;;  %p2374_p10 = scmp.ne.s32.totalorder %s1907_s27, %s2373_s29  ;;  %p2379_p12 = scmp.lt.s32.totalorder %s2373_s29, %s2373_s29 }
  0x3f   :  { %v1942_v19 = vcombine.high %v189_v16, %v193_v17  ;;  %v197_v21 = vld [vmem:[#allocation2 + $0x40] sm:$0xff]  ;;  %v1941_v23 = vcombine.low %v189_v16, %v193_v17  ;;  %v1956_v29 = vcombine.high %v200_v26, %v204_v27  ;;  %v208_v30 = vld [vmem:[#allocation2 + $0x98] sm:$0xff]  ;;  %1080 = vmatprep.subr.bf16.mxu0 %v1948_v24  ;;  %v1955_v34 = vcombine.low %v200_v26, %v204_v27 }
  0x40   :  { %v201_v22 = vld [vmem:[#allocation2 + $0x60] sm:$0xff]  ;;  %115 = vmatpush1.bf16.msra.mxu1 %v82_v12  ;;  %v212_v31 = vld [vmem:[#allocation2 + $0xb8] sm:$0xff]  ;;  %1081 = vmatpush1.bf16.msra.mxu0 %v1947_v25  ;;  %p2380_p13 = por %p2379_p12, %p2378_p11 }
  0x41   :  { %957 = vmatprep.subr.bf16.mxu1 %v1942_v19  ;;  %v1950_v28 = vcombine.high %v197_v21, %v201_v22  ;;  %1129 = vperm.xlu0 %2180, %v1125_v15   ;;  %v205_v32 = vld [vmem:[#allocation2 + $0x80] sm:$0xff]  ;;  %v1949_v35 = vcombine.low %v197_v21, %v201_v22  ;;  %v1964_v36 = vcombine.high %v208_v30, %v212_v31  ;;  %v216_v40 = vld [vmem:[#allocation2 + $0xd8] sm:$0xff] }
  0x42   :  { %v209_v33 = vld [vmem:[#allocation2 + $0xa0] sm:$0xff]  ;;  %1082 = vmatprep.subr.bf16.mxu0 %v1956_v29  ;;  %v220_v41 = vld [vmem:[#allocation2 + $0xf8] sm:$0xff]  ;;  %v1963_v43 = vcombine.low %v208_v30, %v212_v31  ;;  %p2381_p0 = pnand %p2380_p13, %p2374_p10 }
  0x43   :  { %1938 = vmatmul.mubr.msk.bf16.vlgmr.msra.gmra.mrb[0].mxu1 %vm102_vm0, %v2182_v13  ;;  %v1958_v37 = vcombine.high %v205_v32, %v209_v33  ;;  %v213_v38 = vld [vmem:[#allocation2 + $0xc0] sm:$0xff]  ;;  %v1957_v44 = vcombine.low %v205_v32, %v209_v33  ;;  %v1972_v46 = vcombine.high %v216_v40, %v220_v41  ;;  %v224_v47 = vld [vmem:[#allocation2 + $0x118] sm:$0xff]  ;;  %v1971_v51 = vcombine.low %v216_v40, %v220_v41 }
  0x44   :  { %154 = vmatprep.mubr.bf16.mxu1 %v2432_v0  ;;  %958 = vmatpush1.bf16.msra.mxu1 %v1941_v23  ;;  %v217_v39 = vld [vmem:[#allocation2 + $0xe0] sm:$0xff]  ;;  %v228_v48 = vld [vmem:[#allocation2 + $0x138] sm:$0xff] }
  0x45   :  { %959 = vmatprep.subr.bf16.mxu1 %v1950_v28  ;;  %1083 = vmatpush1.bf16.msra.mxu0 %v1955_v34  ;;  %v1966_v45 = vcombine.high %v213_v38, %v217_v39  ;;  %v221_v49 = vld [vmem:[#allocation2 + $0x100] sm:$0xff]  ;;  %v232_v52 = vld [vmem:[#allocation2 + $0x158] sm:$0xff]  ;;  %v1965_v54 = vcombine.low %v213_v38, %v217_v39  ;;  %v1980_v55 = vcombine.high %v224_v47, %v228_v48 }
  0x46   :  { %1084 = vmatprep.subr.bf16.mxu0 %v1964_v36  ;;  %v225_v50 = vld [vmem:[#allocation2 + $0x120] sm:$0xff]  ;;  %v236_v53 = vld [vmem:[#allocation2 + $0x178] sm:$0xff]  ;;  %v1979_v60 = vcombine.low %v224_v47, %v228_v48 }
  0x47   :  { %v229_v56 = vld [vmem:[#allocation2 + $0x140] sm:$0xff]  ;;  %v1974_v59 = vcombine.high %v221_v49, %v225_v50  ;;  %v240_v61 = vld [vmem:[#allocation2 + $0x198] sm:$0xff]  ;;  %v1973_v63 = vcombine.low %v221_v49, %v225_v50  ;;  %v1988_v1 = vcombine.high %v232_v52, %v236_v53  ;;  %v1987_v5 = vcombine.low %v232_v52, %v236_v53 }
  0x48   :  { %960 = vmatpush1.bf16.msra.mxu1 %v1949_v35  ;;  %v233_v57 = vld [vmem:[#allocation2 + $0x160] sm:$0xff]  ;;  %v244_v62 = vld [vmem:[#allocation2 + $0x1b8] sm:$0xff] }
  0x49   :  { %961 = vmatprep.subr.bf16.mxu1 %v1958_v37  ;;  %1085 = vmatpush1.bf16.msra.mxu0 %v1963_v43  ;;  %v237_v2 = vld [vmem:[#allocation2 + $0x180] sm:$0xff]  ;;  %v1982_v4 = vcombine.high %v229_v56, %v233_v57  ;;  %v248_v6 = vld [vmem:[#allocation2 + $0x1d8] sm:$0xff]  ;;  %v1981_v8 = vcombine.low %v229_v56, %v233_v57  ;;  %v1996_v9 = vcombine.high %v240_v61, %v244_v62 }
  0x4a   :  { %1086 = vmatprep.subr.bf16.mxu0 %v1972_v46  ;;  %v241_v3 = vld [vmem:[#allocation2 + $0x1a0] sm:$0xff]  ;;  %v252_v7 = vld [vmem:[#allocation2 + $0x1f8] sm:$0xff]  ;;  %v1995_v13 = vcombine.low %v240_v61, %v244_v62 }
  0x4b   :  { %1939 = vmatmul.mubr.msk.bf16.gmra.mrb[4].mxu1 %vm102_vm0, %v2183_v42  ;;  %v245_v10 = vld [vmem:[#allocation2 + $0x1c0] sm:$0xff]  ;;  %v1990_v12 = vcombine.high %v237_v2, %v241_v3  ;;  %v256_v14 = vld [vmem:[#allocation2 + $0x218] sm:$0xff]  ;;  %v1989_v16 = vcombine.low %v237_v2, %v241_v3  ;;  %v2004_v17 = vcombine.high %v248_v6, %v252_v7  ;;  %v2003_v21 = vcombine.low %v248_v6, %v252_v7 }
  0x4c   :  { %164 = vmatprep.mubr.bf16.mxu1 %v2432_v0  ;;  %962 = vmatpush1.bf16.msra.mxu1 %v1957_v44  ;;  %v249_v11 = vld [vmem:[#allocation2 + $0x1e0] sm:$0xff]  ;;  %v260_v15 = vld [vmem:[#allocation2 + $0x238] sm:$0xff] }
  0x4d   :  { %963 = vmatprep.subr.bf16.mxu1 %v1966_v45  ;;  %1087 = vmatpush1.bf16.msra.mxu0 %v1971_v51  ;;  %v253_v18 = vld [vmem:[#allocation2 + $0x200] sm:$0xff]  ;;  %v1998_v20 = vcombine.high %v245_v10, %v249_v11  ;;  %v264_v22 = vld [vmem:[#allocation2 + $0x258] sm:$0xff]  ;;  %v1997_v24 = vcombine.low %v245_v10, %v249_v11  ;;  %v2012_v25 = vcombine.high %v256_v14, %v260_v15 }
  0x4e   :  { %1088 = vmatprep.subr.bf16.mxu0 %v1980_v55  ;;  %v257_v19 = vld [vmem:[#allocation2 + $0x220] sm:$0xff]  ;;  %v268_v23 = vld [vmem:[#allocation2 + $0x278] sm:$0xff]  ;;  %v2011_v29 = vcombine.low %v256_v14, %v260_v15 }
  0x4f   :  { %v261_v26 = vld [vmem:[#allocation2 + $0x240] sm:$0xff]  ;;  %v2006_v28 = vcombine.high %v253_v18, %v257_v19  ;;  %v2005_v30 = vcombine.low %v253_v18, %v257_v19  ;;  %v2020_v31 = vcombine.high %v264_v22, %v268_v23  ;;  %v2019_v33 = vcombine.low %v264_v22, %v268_v23  ;;  %v272_v38 = vld [vmem:[#allocation2 + $0x298] sm:$0xff] }
  0x50   :  { %964 = vmatpush1.bf16.msra.mxu1 %v1965_v54  ;;  %v265_v27 = vld [vmem:[#allocation2 + $0x260] sm:$0xff]  ;;  %v276_v39 = vld [vmem:[#allocation2 + $0x2b8] sm:$0xff] }
  0x51   :  { %965 = vmatprep.subr.bf16.mxu1 %v1974_v59  ;;  %1089 = vmatpush1.bf16.msra.mxu0 %v1979_v60  ;;  %v2014_v32 = vcombine.high %v261_v26, %v265_v27  ;;  %v2013_v34 = vcombine.low %v261_v26, %v265_v27  ;;  %v269_v35 = vld [vmem:[#allocation2 + $0x280] sm:$0xff]  ;;  %v2028_v41 = vcombine.high %v272_v38, %v276_v39  ;;  %v280_v46 = vld [vmem:[#allocation2 + $0x2d8] sm:$0xff] }
  0x52   :  { %1090 = vmatprep.subr.bf16.mxu0 %v1988_v1  ;;  %v273_v36 = vld [vmem:[#allocation2 + $0x2a0] sm:$0xff]  ;;  %v2027_v42 = vcombine.low %v272_v38, %v276_v39  ;;  %v284_v47 = vld [vmem:[#allocation2 + $0x2f8] sm:$0xff]  ;;  %v202_v38 = vld [vmem:[#allocation2 + $0x68] sm:$0xff] }
  0x53   :  { %1940 = vmatmul.mubr.msk.bf16.gmra.mrb[8].mxu1 %vm102_vm0, %v2184_v58  ;;  %v2022_v37 = vcombine.high %v269_v35, %v273_v36  ;;  %v2021_v40 = vcombine.low %v269_v35, %v273_v36  ;;  %v277_v43 = vld [vmem:[#allocation2 + $0x2c0] sm:$0xff]  ;;  %v2036_v49 = vcombine.high %v280_v46, %v284_v47  ;;  %v2035_v50 = vcombine.low %v280_v46, %v284_v47  ;;  %v288_v53 = vld [vmem:[#allocation2 + $0x318] sm:$0xff]  ;;  %v214_v46 = vld [vmem:[#allocation2 + $0xc8] sm:$0xff] }
  0x54   :  { %966 = vmatpush1.bf16.msra.mxu1 %v1973_v63  ;;  %v281_v44 = vld [vmem:[#allocation2 + $0x2e0] sm:$0xff]  ;;  %v292_v56 = vld [vmem:[#allocation2 + $0x338] sm:$0xff]  ;;  %v218_v47 = vld [vmem:[#allocation2 + $0xe8] sm:$0xff] }
  0x55   :  { %967 = vmatprep.subr.bf16.mxu1 %v1982_v4  ;;  %1091 = vmatpush1.bf16.msra.mxu0 %v1987_v5  ;;  %v2030_v45 = vcombine.high %v277_v43, %v281_v44  ;;  %v2029_v48 = vcombine.low %v277_v43, %v281_v44  ;;  %v285_v51 = vld [vmem:[#allocation2 + $0x300] sm:$0xff]  ;;  %v2044_v59 = vcombine.high %v288_v53, %v292_v56  ;;  %v296_v62 = vld [vmem:[#allocation2 + $0x358] sm:$0xff]  ;;  %v210_v43 = vld [vmem:[#allocation2 + $0xa8] sm:$0xff] }
  0x56   :  { %1092 = vmatprep.subr.bf16.mxu0 %v1996_v9  ;;  %v289_v52 = vld [vmem:[#allocation2 + $0x320] sm:$0xff]  ;;  %v2043_v60 = vcombine.low %v288_v53, %v292_v56  ;;  %v300_v63 = vld [vmem:[#allocation2 + $0x378] sm:$0xff] }
  0x57   :  { %v2037_v54 = vcombine.low %v285_v51, %v289_v52  ;;  %v2038_v55 = vcombine.high %v285_v51, %v289_v52  ;;  %v293_v57 = vld [vmem:[#allocation2 + $0x340] sm:$0xff]  ;;  %v2052_v1 = vcombine.high %v296_v62, %v300_v63  ;;  %v2051_v3 = vcombine.low %v296_v62, %v300_v63  ;;  %v304_v7 = vld [vmem:[#allocation2 + $0x398] sm:$0xff]  ;;  %v226_v51 = vld [vmem:[#allocation2 + $0x128] sm:$0xff] }
  0x58   :  { %968 = vmatpush1.bf16.msra.mxu1 %v1981_v8  ;;  %v297_v58 = vld [vmem:[#allocation2 + $0x360] sm:$0xff]  ;;  %v308_v8 = vld [vmem:[#allocation2 + $0x3b8] sm:$0xff]  ;;  %v1967_v52 = vcombine.low %v214_v46, %v218_v47  ;;  %v246_v62 = vld [vmem:[#allocation2 + $0x1c8] sm:$0xff] }
  0x59   :  { %969 = vmatprep.subr.bf16.mxu1 %v1990_v12  ;;  %1093 = vmatpush1.bf16.msra.mxu0 %v1995_v13  ;;  %v2046_v61 = vcombine.high %v293_v57, %v297_v58  ;;  %v2045_v2 = vcombine.low %v293_v57, %v297_v58  ;;  %v301_v4 = vld [vmem:[#allocation2 + $0x380] sm:$0xff]  ;;  %v2060_v10 = vcombine.high %v304_v7, %v308_v8  ;;  %v312_v15 = vld [vmem:[#allocation2 + $0x3d8] sm:$0xff]  ;;  %v238_v58 = vld [vmem:[#allocation2 + $0x188] sm:$0xff] }
  0x5a   :  { %1094 = vmatprep.subr.bf16.mxu0 %v2004_v17  ;;  %v305_v5 = vld [vmem:[#allocation2 + $0x3a0] sm:$0xff]  ;;  %v2059_v11 = vcombine.low %v304_v7, %v308_v8  ;;  %v250_v63 = vld [vmem:[#allocation2 + $0x1e8] sm:$0xff] }
  0x5b   :  { %v2054_v6 = vcombine.high %v301_v4, %v305_v5  ;;  %v2053_v9 = vcombine.low %v301_v4, %v305_v5  ;;  %v309_v12 = vld [vmem:[#allocation2 + $0x3c0] sm:$0xff]  ;;  %v258_v4 = vld [vmem:[#allocation2 + $0x228] sm:$0xff]  ;;  %v1999_v5 = vcombine.low %v246_v62, %v250_v63 }
  0x5c   :  { %970 = vmatpush1.bf16.msra.mxu1 %v1989_v16  ;;  %v313_v13 = vld [vmem:[#allocation2 + $0x3e0] sm:$0xff]  ;;  %v316_v16 = vld [vmem:[#allocation2 + $0x3f8] sm:$0xff]  ;;  %v262_v7 = vld [vmem:[#allocation2 + $0x248] sm:$0xff] }
  0x5d   :  { %971 = vmatprep.subr.bf16.mxu1 %v1998_v20  ;;  %1095 = vmatpush1.bf16.msra.mxu0 %v2003_v21  ;;  %v2062_v14 = vcombine.high %v309_v12, %v313_v13  ;;  %v2061_v17 = vcombine.low %v309_v12, %v313_v13  ;;  %v2068_v18 = vcombine.high %v312_v15, %v316_v16  ;;  %v190_v20 = vld [vmem:[#allocation2 + $0x8] sm:$0xff] }
  0x5e   :  { %1096 = vmatprep.subr.bf16.mxu0 %v2012_v25  ;;  %v2067_v19 = vcombine.low %v312_v15, %v316_v16  ;;  %v194_v21 = vld [vmem:[#allocation2 + $0x28] sm:$0xff] }
  0x5f   :  { %v1944_v22 = vcombine.high %v190_v20, %v194_v21  ;;  %v1943_v23 = vcombine.low %v190_v20, %v194_v21  ;;  %v266_v8 = vld [vmem:[#allocation2 + $0x268] sm:$0xff] }
  0x60   :  { %972 = vmatpush1.bf16.msra.mxu1 %v1997_v24  ;;  %v274_v12 = vld [vmem:[#allocation2 + $0x2a8] sm:$0xff]  ;;  %v2015_v13 = vcombine.low %v262_v7, %v266_v8 }
  0x61   :  { %973 = vmatprep.subr.bf16.mxu1 %v2006_v28  ;;  %1097 = vmatpush1.bf16.msra.mxu0 %v2011_v29  ;;  %v278_v15 = vld [vmem:[#allocation2 + $0x2c8] sm:$0xff] }
  0x62   :  { %1098 = vmatprep.subr.bf16.mxu0 %v2020_v31  ;;  %v282_v16 = vld [vmem:[#allocation2 + $0x2e8] sm:$0xff] }
  0x63   :  { %v290_v20 = vld [vmem:[#allocation2 + $0x328] sm:$0xff]  ;;  %v2031_v21 = vcombine.low %v278_v15, %v282_v16 }
  0x64   :  { %974 = vmatpush1.bf16.msra.mxu1 %v2005_v30 }
  0x65   :  { %975 = vmatprep.subr.bf16.mxu1 %v2014_v32  ;;  %1099 = vmatpush1.bf16.msra.mxu0 %v2019_v33 }
  0x66   :  { %1100 = vmatprep.subr.bf16.mxu0 %v2028_v41 }
  0x68   :  { %976 = vmatpush1.bf16.msra.mxu1 %v2013_v34 }
  0x69   :  { %977 = vmatprep.subr.bf16.mxu1 %v2022_v37  ;;  %1101 = vmatpush1.bf16.msra.mxu0 %v2027_v42  ;;  %v198_v37 = vld [vmem:[#allocation2 + $0x48] sm:$0xff] }
  0x6a   :  { %1102 = vmatprep.subr.bf16.mxu0 %v2036_v49  ;;  %v1952_v41 = vcombine.high %v198_v37, %v202_v38  ;;  %v206_v42 = vld [vmem:[#allocation2 + $0x88] sm:$0xff]  ;;  %v1951_v44 = vcombine.low %v198_v37, %v202_v38  ;;  %v1968_v49 = vcombine.high %v214_v46, %v218_v47  ;;  %v191_v37 = vld [vmem:[#allocation2 + $0x10] sm:$0xff] }
  0x6b   :  { %v195_v38 = vld [vmem:[#allocation2 + $0x30] sm:$0xff] }
  0x6c   :  { %978 = vmatpush1.bf16.msra.mxu1 %v2021_v40  ;;  %v207_v47 = vld [vmem:[#allocation2 + $0x90] sm:$0xff] }
  0x6d   :  { %979 = vmatprep.subr.bf16.mxu1 %v2030_v45  ;;  %1103 = vmatpush1.bf16.msra.mxu0 %v2035_v50  ;;  %v1960_v45 = vcombine.high %v206_v42, %v210_v43  ;;  %v222_v50 = vld [vmem:[#allocation2 + $0x108] sm:$0xff] }
  0x6e   :  { %1104 = vmatprep.subr.bf16.mxu0 %v2044_v59  ;;  %v1976_v53 = vcombine.high %v222_v50, %v226_v51  ;;  %v1975_v56 = vcombine.low %v222_v50, %v226_v51  ;;  %v242_v59 = vld [vmem:[#allocation2 + $0x1a8] sm:$0xff]  ;;  %v215_v51 = vld [vmem:[#allocation2 + $0xd0] sm:$0xff] }
  0x70   :  { %980 = vmatpush1.bf16.msra.mxu1 %v2029_v48  ;;  %v1959_v48 = vcombine.low %v206_v42, %v210_v43  ;;  %v1946_v42 = vcombine.high %v191_v37, %v195_v38  ;;  %v199_v43 = vld [vmem:[#allocation2 + $0x50] sm:$0xff] }
  0x71   :  { %981 = vmatprep.subr.bf16.mxu1 %v2038_v55  ;;  %1105 = vmatpush1.bf16.msra.mxu0 %v2043_v60  ;;  %v234_v55 = vld [vmem:[#allocation2 + $0x168] sm:$0xff] }
  0x72   :  { %1106 = vmatprep.subr.bf16.mxu0 %v2052_v1  ;;  %v1991_v1 = vcombine.low %v238_v58, %v242_v59 }
  0x74   :  { %982 = vmatpush1.bf16.msra.mxu1 %v2037_v54  ;;  %v230_v54 = vld [vmem:[#allocation2 + $0x148] sm:$0xff] }
  0x75   :  { %983 = vmatprep.subr.bf16.mxu1 %v2046_v61  ;;  %1107 = vmatpush1.bf16.msra.mxu0 %v2051_v3  ;;  %v1984_v57 = vcombine.high %v230_v54, %v234_v55  ;;  %v1983_v60 = vcombine.low %v230_v54, %v234_v55  ;;  %v1992_v61 = vcombine.high %v238_v58, %v242_v59  ;;  %v254_v3 = vld [vmem:[#allocation2 + $0x208] sm:$0xff]  ;;  %v223_v55 = vld [vmem:[#allocation2 + $0x110] sm:$0xff] }
  0x76   :  { %1108 = vmatprep.subr.bf16.mxu0 %v2060_v10  ;;  %v2016_v10 = vcombine.high %v262_v7, %v266_v8  ;;  %v231_v59 = vld [vmem:[#allocation2 + $0x150] sm:$0xff] }
  0x77   :  { %v255_v7 = vld [vmem:[#allocation2 + $0x210] sm:$0xff] }
  0x78   :  { %984 = vmatpush1.bf16.msra.mxu1 %v2045_v2  ;;  %v2000_v2 = vcombine.high %v246_v62, %v250_v63  ;;  %v239_v62 = vld [vmem:[#allocation2 + $0x190] sm:$0xff] }
  0x79   :  { %985 = vmatprep.subr.bf16.mxu1 %v2054_v6  ;;  %1109 = vmatpush1.bf16.msra.mxu0 %v2059_v11  ;;  %v2008_v6 = vcombine.high %v254_v3, %v258_v4  ;;  %v270_v11 = vld [vmem:[#allocation2 + $0x288] sm:$0xff]  ;;  %v243_v63 = vld [vmem:[#allocation2 + $0x1b0] sm:$0xff] }
  0x7a   :  { %1110 = vmatprep.subr.bf16.mxu0 %v2068_v18  ;;  %v2032_v18 = vcombine.high %v278_v15, %v282_v16  ;;  %v259_v8 = vld [vmem:[#allocation2 + $0x230] sm:$0xff] }
  0x7b   :  { %v271_v15 = vld [vmem:[#allocation2 + $0x290] sm:$0xff] }
  0x7c   :  { %986 = vmatpush1.bf16.msra.mxu1 %v2053_v9  ;;  %v2007_v9 = vcombine.low %v254_v3, %v258_v4  ;;  %v247_v3 = vld [vmem:[#allocation2 + $0x1d0] sm:$0xff] }
  0x7d   :  { %987 = vmatprep.subr.bf16.mxu1 %v2062_v14  ;;  %1111 = vmatpush1.bf16.msra.mxu0 %v2067_v19  ;;  %v2024_v14 = vcombine.high %v270_v11, %v274_v12  ;;  %v286_v19 = vld [vmem:[#allocation2 + $0x308] sm:$0xff]  ;;  %v251_v4 = vld [vmem:[#allocation2 + $0x1f0] sm:$0xff] }
  0x7e   :  { %v275_v16 = vld [vmem:[#allocation2 + $0x2b0] sm:$0xff] }
  0x80   :  { %988 = vmatpush1.bf16.msra.mxu1 %v2061_v17  ;;  %v2023_v17 = vcombine.low %v270_v11, %v274_v12  ;;  %v263_v11 = vld [vmem:[#allocation2 + $0x250] sm:$0xff] }
  0x81   :  { %998 = vmatprep.subr.bf16.mxu1 %v1944_v22  ;;  %v2040_v22 = vcombine.high %v286_v19, %v290_v20  ;;  %v267_v12 = vld [vmem:[#allocation2 + $0x270] sm:$0xff] }
  0xbc   :  { %v181_v28 = vpop.permute.xlu0 %180 }
 0x116   :  { %v146_v24 = vpop.f32.mrb[0].mxu1 }
 0x117   :  { %173 = vst [vmem:[#allocation8] sm:$0xff] %v146_v24  ;;  %v148_v25 = vpop.f32.mrb[1].mxu1  ;;  %v298_v24 = vld [vmem:[#allocation2 + $0x368] sm:$0xff] }
 0x118   :  { %174 = vst [vmem:[#allocation8 + $0x8] sm:$0xff] %v148_v25  ;;  %v150_v26 = vpop.f32.mrb[2].mxu1  ;;  %v2039_v25 = vcombine.low %v286_v19, %v290_v20  ;;  %v279_v19 = vld [vmem:[#allocation2 + $0x2d0] sm:$0xff] }
 0x119   :  { %175 = vst [vmem:[#allocation8 + $0x10] sm:$0xff] %v150_v26  ;;  %v152_v27 = vpop.f32.mrb[3].mxu1  ;;  %v283_v20 = vld [vmem:[#allocation2 + $0x2f0] sm:$0xff] }
 0x11a   :  { %176 = vst [vmem:[#allocation8 + $0x18] sm:$0xff] %v152_v27  ;;  %v302_v27 = vld [vmem:[#allocation2 + $0x388] sm:$0xff] }
 0x126   :  { %v166_v29 = vpop.f32.mrb[8].mxu1 }
 0x127   :  { %v183_v30 = vadd.f32 %v181_v28, %v166_v29  ;;  %v168_v31 = vpop.f32.mrb[9].mxu1 }
 0x128   :  { %v184_v32 = vadd.f32 %v181_v28, %v168_v31  ;;  %v170_v33 = vpop.f32.mrb[10].mxu1  ;;  %v306_v28 = vld [vmem:[#allocation2 + $0x3a8] sm:$0xff] }
 0x129   :  { %v2571_v34 = vmax.f32 %v183_v30, 0.0  ;;  %v171_v35 = vpop.f32.mrb[11].mxu1  ;;  %v2056_v30 = vcombine.high %v302_v27, %v306_v28  ;;  %v310_v31 = vld [vmem:[#allocation2 + $0x3c8] sm:$0xff]  ;;  %v2055_v33 = vcombine.low %v302_v27, %v306_v28  ;;  %v295_v27 = vld [vmem:[#allocation2 + $0x350] sm:$0xff] }
 0x12a   :  { %v2573_v36 = vmax.f32 %v184_v32, 0.0  ;;  %v314_v32 = vld [vmem:[#allocation2 + $0x3e8] sm:$0xff]  ;;  %v299_v28 = vld [vmem:[#allocation2 + $0x370] sm:$0xff] }
 0x12b   :  { %v2581_v40 = vpack.c.bf16 %v2571_v34, %v2571_v34  ;;  %v2064_v35 = vcombine.high %v310_v31, %v314_v32 }
 0x12c   :  { %v2577_v39 = vpack.c.bf16 %v2573_v36, %v2573_v36 }
 0x12e   :  { %989 = vmatprep.mubr.bf16.mxu1 %v2577_v39  ;;  %1112 = vmatprep.mubr.bf16.mxu0 %v2577_v39 }
 0x12f   :  { %990 = vmatmul.mubr.bf16.vlgmr.msra.gmra.mrb[12].mxu1 %v2581_v40  ;;  %1113 = vmatmul.mubr.bf16.vlgmr.msra.gmra.mrb[0].mxu0 %v2581_v40 }
 0x130   :  { %999 = vmatpush1.bf16.msra.mxu1 %v1943_v23  ;;  %1030 = vmatprep.mubr.bf16.mxu1 %v2577_v39  ;;  %v294_v23 = vld [vmem:[#allocation2 + $0x348] sm:$0xff] }
 0x131   :  { %1000 = vmatprep.subr.bf16.mxu1 %v1952_v41  ;;  %v2048_v26 = vcombine.high %v294_v23, %v298_v24  ;;  %v2047_v29 = vcombine.low %v294_v23, %v298_v24  ;;  %v2063_v41 = vcombine.low %v310_v31, %v314_v32  ;;  %v287_v23 = vld [vmem:[#allocation2 + $0x310] sm:$0xff] }
 0x132   :  { %v291_v24 = vld [vmem:[#allocation2 + $0x330] sm:$0xff] }
 0x133   :  { %v303_v31 = vld [vmem:[#allocation2 + $0x390] sm:$0xff] }
 0x134   :  { %1001 = vmatpush1.bf16.msra.mxu1 %v1951_v44  ;;  %v203_v44 = vld [vmem:[#allocation2 + $0x70] sm:$0xff] }
 0x135   :  { %1002 = vmatprep.subr.bf16.mxu1 %v1960_v45  ;;  %v1945_v45 = vcombine.low %v191_v37, %v195_v38  ;;  %v1954_v46 = vcombine.high %v199_v43, %v203_v44  ;;  %v307_v32 = vld [vmem:[#allocation2 + $0x3b0] sm:$0xff] }
 0x136   :  { %v311_v37 = vld [vmem:[#allocation2 + $0x3d0] sm:$0xff] }
 0x137   :  { %v315_v38 = vld [vmem:[#allocation2 + $0x3f0] sm:$0xff] }
 0x138   :  { %1003 = vmatpush1.bf16.msra.mxu1 %v1959_v48  ;;  %v211_v48 = vld [vmem:[#allocation2 + $0xb0] sm:$0xff] }
 0x139   :  { %1004 = vmatprep.subr.bf16.mxu1 %v1968_v49  ;;  %v1953_v49 = vcombine.low %v199_v43, %v203_v44  ;;  %v1962_v50 = vcombine.high %v207_v47, %v211_v48  ;;  %v2065_v43 = vcombine.low %v311_v37, %v315_v38 }
 0x13c   :  { %1005 = vmatpush1.bf16.msra.mxu1 %v1967_v52  ;;  %v219_v52 = vld [vmem:[#allocation2 + $0xf0] sm:$0xff] }
 0x13d   :  { %1006 = vmatprep.subr.bf16.mxu1 %v1976_v53  ;;  %v1961_v53 = vcombine.low %v207_v47, %v211_v48  ;;  %v1970_v54 = vcombine.high %v215_v51, %v219_v52 }
 0x140   :  { %1007 = vmatpush1.bf16.msra.mxu1 %v1975_v56  ;;  %v227_v56 = vld [vmem:[#allocation2 + $0x130] sm:$0xff] }
 0x141   :  { %1008 = vmatprep.subr.bf16.mxu1 %v1984_v57  ;;  %v1969_v57 = vcombine.low %v215_v51, %v219_v52  ;;  %v1978_v58 = vcombine.high %v223_v55, %v227_v56  ;;  %v1126_v52 = vld [vmem:[%s2662_s5 + $0x10] sm:$0xff] }
 0x142   :  { %1134 = vperm.xlu1 %2181, %v1126_v52  }
 0x144   :  { %1009 = vmatpush1.bf16.msra.mxu1 %v1983_v60  ;;  %v235_v60 = vld [vmem:[#allocation2 + $0x170] sm:$0xff] }
 0x145   :  { %1010 = vmatprep.subr.bf16.mxu1 %v1992_v61  ;;  %v1977_v61 = vcombine.low %v223_v55, %v227_v56  ;;  %v2189_v55 = vld [vmem:[#allocation5 + $0x10] ss:$8 sps:$4 sm:$0xff]   ;;  %v2194_v56 = vld [vmem:[#allocation5 + $0x24] ss:$8 sps:$4 sm:$0xff]  }
 0x148   :  { %1011 = vmatpush1.bf16.msra.mxu1 %v1991_v1  ;;  %v1985_v1 = vcombine.low %v231_v59, %v235_v60 }
 0x149   :  { %1012 = vmatprep.subr.bf16.mxu1 %v2000_v2  ;;  %v1994_v2 = vcombine.high %v239_v62, %v243_v63 }
 0x14c   :  { %1013 = vmatpush1.bf16.msra.mxu1 %v1999_v5  ;;  %v1993_v5 = vcombine.low %v239_v62, %v243_v63  ;;  %v2201_v62 = vld [vmem:[#allocation5 + $0x50] ss:$8 sps:$4 sm:$0xff]   ;;  %v2206_v63 = vld [vmem:[#allocation5 + $0x64] ss:$8 sps:$4 sm:$0xff]  }
 0x14d   :  { %1014 = vmatprep.subr.bf16.mxu1 %v2008_v6  ;;  %v2002_v6 = vcombine.high %v247_v3, %v251_v4 }
 0x150   :  { %1015 = vmatpush1.bf16.msra.mxu1 %v2007_v9  ;;  %v2001_v9 = vcombine.low %v247_v3, %v251_v4  ;;  %v2207_v3 = vld [vmem:[#allocation5 + $0x70] ss:$8 sps:$4 sm:$0xff]   ;;  %v2212_v4 = vld [vmem:[#allocation5 + $0x84] ss:$8 sps:$4 sm:$0xff]  }
 0x151   :  { %1016 = vmatprep.subr.bf16.mxu1 %v2016_v10  ;;  %v2010_v10 = vcombine.high %v255_v7, %v259_v8 }
 0x154   :  { %1017 = vmatpush1.bf16.msra.mxu1 %v2015_v13  ;;  %v2009_v13 = vcombine.low %v255_v7, %v259_v8  ;;  %v2213_v7 = vld [vmem:[#allocation5 + $0x90] ss:$8 sps:$4 sm:$0xff]   ;;  %v2218_v8 = vld [vmem:[#allocation5 + $0xa4] ss:$8 sps:$4 sm:$0xff]  }
 0x155   :  { %1018 = vmatprep.subr.bf16.mxu1 %v2024_v14  ;;  %v2018_v14 = vcombine.high %v263_v11, %v267_v12 }
 0x158   :  { %1019 = vmatpush1.bf16.msra.mxu1 %v2023_v17  ;;  %v2017_v17 = vcombine.low %v263_v11, %v267_v12  ;;  %v2219_v11 = vld [vmem:[#allocation5 + $0xb0] ss:$8 sps:$4 sm:$0xff]   ;;  %v2224_v12 = vld [vmem:[#allocation5 + $0xc4] ss:$8 sps:$4 sm:$0xff]  }
 0x159   :  { %1020 = vmatprep.subr.bf16.mxu1 %v2032_v18  ;;  %v2026_v18 = vcombine.high %v271_v15, %v275_v16 }
 0x15c   :  { %1021 = vmatpush1.bf16.msra.mxu1 %v2031_v21  ;;  %v2025_v21 = vcombine.low %v271_v15, %v275_v16  ;;  %v2225_v15 = vld [vmem:[#allocation5 + $0xd0] ss:$8 sps:$4 sm:$0xff]  }
 0x15d   :  { %1022 = vmatprep.subr.bf16.mxu1 %v2040_v22  ;;  %v2034_v22 = vcombine.high %v279_v19, %v283_v20 }
 0x160   :  { %1023 = vmatpush1.bf16.msra.mxu1 %v2039_v25  ;;  %v2033_v25 = vcombine.low %v279_v19, %v283_v20 }
 0x161   :  { %1024 = vmatprep.subr.bf16.mxu1 %v2048_v26  ;;  %v2042_v26 = vcombine.high %v287_v23, %v291_v24 }
 0x164   :  { %1025 = vmatpush1.bf16.msra.mxu1 %v2047_v29  ;;  %v2041_v29 = vcombine.low %v287_v23, %v291_v24 }
 0x165   :  { %1026 = vmatprep.subr.bf16.mxu1 %v2056_v30  ;;  %v2050_v30 = vcombine.high %v295_v27, %v299_v28 }
 0x168   :  { %1027 = vmatpush1.bf16.msra.mxu1 %v2055_v33  ;;  %v2049_v33 = vcombine.low %v295_v27, %v299_v28 }
 0x169   :  { %1028 = vmatprep.subr.bf16.mxu1 %v2064_v35  ;;  %v2058_v35 = vcombine.high %v303_v31, %v307_v32 }
 0x16c   :  { %1029 = vmatpush1.bf16.msra.mxu1 %v2063_v41  ;;  %v2057_v41 = vcombine.low %v303_v31, %v307_v32 }
 0x16d   :  { %1039 = vmatprep.subr.bf16.mxu1 %v1946_v42  ;;  %v2066_v42 = vcombine.high %v311_v37, %v315_v38 }
 0x16f   :  { %1031 = vmatmul.mubr.bf16.vlgmr.msra.gmra.mrb[16].mxu1 %v2581_v40 }
 0x170   :  { %1040 = vmatpush1.bf16.msra.mxu1 %v1945_v45  ;;  %1071 = vmatprep.mubr.bf16.mxu1 %v2577_v39  ;;  %v1986_v39 = vcombine.high %v231_v59, %v235_v60  ;;  %v2195_v59 = vld [vmem:[#allocation5 + $0x30] ss:$8 sps:$4 sm:$0xff]   ;;  %v2200_v60 = vld [vmem:[#allocation5 + $0x44] ss:$8 sps:$4 sm:$0xff]  }
 0x171   :  { %1041 = vmatprep.subr.bf16.mxu1 %v1954_v46 }
 0x174   :  { %1042 = vmatpush1.bf16.msra.mxu1 %v1953_v49 }
 0x175   :  { %1043 = vmatprep.subr.bf16.mxu1 %v1962_v50 }
 0x178   :  { %1044 = vmatpush1.bf16.msra.mxu1 %v1961_v53  ;;  %v2186_v53 = vld [vmem:[#allocation5] ss:$8 sps:$4 sm:$0xff]  }
 0x179   :  { %1045 = vmatprep.subr.bf16.mxu1 %v1970_v54  ;;  %v2191_v54 = vld [vmem:[#allocation5 + $0x14] ss:$8 sps:$4 sm:$0xff]  }
 0x17c   :  { %1046 = vmatpush1.bf16.msra.mxu1 %v1969_v57  ;;  %v2192_v57 = vld [vmem:[#allocation5 + $0x20] ss:$8 sps:$4 sm:$0xff]  }
 0x17d   :  { %1047 = vmatprep.subr.bf16.mxu1 %v1978_v58  ;;  %v2197_v58 = vld [vmem:[#allocation5 + $0x34] ss:$8 sps:$4 sm:$0xff]  }
 0x180   :  { %1048 = vmatpush1.bf16.msra.mxu1 %v1977_v61  ;;  %v2198_v61 = vld [vmem:[#allocation5 + $0x40] ss:$8 sps:$4 sm:$0xff]  }
 0x181   :  { %1049 = vmatprep.subr.bf16.mxu1 %v1986_v39  ;;  %v2203_v39 = vld [vmem:[#allocation5 + $0x54] ss:$8 sps:$4 sm:$0xff]  }
 0x184   :  { %1050 = vmatpush1.bf16.msra.mxu1 %v1985_v1  ;;  %v2204_v1 = vld [vmem:[#allocation5 + $0x60] ss:$8 sps:$4 sm:$0xff]  }
 0x185   :  { %1051 = vmatprep.subr.bf16.mxu1 %v1994_v2  ;;  %v2209_v2 = vld [vmem:[#allocation5 + $0x74] ss:$8 sps:$4 sm:$0xff]  }
 0x188   :  { %1052 = vmatpush1.bf16.msra.mxu1 %v1993_v5  ;;  %v2210_v5 = vld [vmem:[#allocation5 + $0x80] ss:$8 sps:$4 sm:$0xff]  }
 0x189   :  { %1053 = vmatprep.subr.bf16.mxu1 %v2002_v6  ;;  %v2215_v6 = vld [vmem:[#allocation5 + $0x94] ss:$8 sps:$4 sm:$0xff]  }
 0x18c   :  { %1054 = vmatpush1.bf16.msra.mxu1 %v2001_v9  ;;  %v2216_v9 = vld [vmem:[#allocation5 + $0xa0] ss:$8 sps:$4 sm:$0xff]  }
 0x18d   :  { %1055 = vmatprep.subr.bf16.mxu1 %v2010_v10  ;;  %v2221_v10 = vld [vmem:[#allocation5 + $0xb4] ss:$8 sps:$4 sm:$0xff]  }
 0x190   :  { %1056 = vmatpush1.bf16.msra.mxu1 %v2009_v13  ;;  %v2222_v13 = vld [vmem:[#allocation5 + $0xc0] ss:$8 sps:$4 sm:$0xff]  }
 0x191   :  { %1057 = vmatprep.subr.bf16.mxu1 %v2018_v14  ;;  %v2227_v14 = vld [vmem:[#allocation5 + $0xd4] ss:$8 sps:$4 sm:$0xff]  }
 0x194   :  { %1058 = vmatpush1.bf16.msra.mxu1 %v2017_v17 }
 0x195   :  { %1059 = vmatprep.subr.bf16.mxu1 %v2026_v18 }
 0x198   :  { %1060 = vmatpush1.bf16.msra.mxu1 %v2025_v21 }
 0x199   :  { %1061 = vmatprep.subr.bf16.mxu1 %v2034_v22  ;;  %v2185_v22 = vld [vmem:[%s2661_s4 + $0x18] sm:$0xff]  }
 0x19c   :  { %1062 = vmatpush1.bf16.msra.mxu1 %v2033_v25 }
 0x19d   :  { %1063 = vmatprep.subr.bf16.mxu1 %v2042_v26 }
 0x1a0   :  { %1064 = vmatpush1.bf16.msra.mxu1 %v2041_v29 }
 0x1a1   :  { %1065 = vmatprep.subr.bf16.mxu1 %v2050_v30 }
 0x1a4   :  { %1066 = vmatpush1.bf16.msra.mxu1 %v2049_v33 }
 0x1a5   :  { %1067 = vmatprep.subr.bf16.mxu1 %v2058_v35 }
 0x1a8   :  { %1068 = vmatpush1.bf16.msra.mxu1 %v2057_v41  ;;  %v2230_v41 = vld [vmem:[#allocation5 + $0xe4] ss:$8 sps:$4 sm:$0xff]  }
 0x1a9   :  { %1069 = vmatprep.subr.bf16.mxu1 %v2066_v42  ;;  %v2228_v42 = vld [vmem:[#allocation5 + $0xe0] ss:$8 sps:$4 sm:$0xff]  }
 0x1ac   :  { %1070 = vmatpush1.bf16.msra.mxu1 %v2065_v43  ;;  %v2233_v43 = vld [vmem:[#allocation5 + $0xf4] ss:$8 sps:$4 sm:$0xff]  }
 0x1af   :  { %1072 = vmatmul.mubr.bf16.vlgmr.msra.gmra.mrb[20].mxu1 %v2581_v40  ;;  %v2188_v40 = vld [vmem:[#allocation5 + $0x4] ss:$8 sps:$4 sm:$0xff]  }
 0x1b0   :  { %1178 = vmatprep.mubr.bf16.mxu1 %v2432_v0  ;;  %1581 = vmatprep.subr.bf16.mxu0 %v2188_v40 }
 0x1b1   :  { %1582 = vmatpush1.bf16.msra.mxu0 %v2186_v53 }
 0x1b2   :  { %1583 = vmatprep.subr.bf16.mxu0 %v2191_v54 }
 0x1b5   :  { %1584 = vmatpush1.bf16.msra.mxu0 %v2189_v55 }
 0x1b6   :  { %1585 = vmatprep.subr.bf16.mxu0 %v2194_v56 }
 0x1b9   :  { %1586 = vmatpush1.bf16.msra.mxu0 %v2192_v57 }
 0x1ba   :  { %1587 = vmatprep.subr.bf16.mxu0 %v2197_v58  ;;  %v2234_v58 = vld [vmem:[#allocation5 + $0x100] ss:$8 sps:$4 sm:$0xff]  }
 0x1bd   :  { %1588 = vmatpush1.bf16.msra.mxu0 %v2195_v59 }
 0x1be   :  { %1589 = vmatprep.subr.bf16.mxu0 %v2200_v60  ;;  %v2239_v60 = vld [vmem:[#allocation5 + $0x114] ss:$8 sps:$4 sm:$0xff]  }
 0x1c1   :  { %1590 = vmatpush1.bf16.msra.mxu0 %v2198_v61 }
 0x1c2   :  { %1591 = vmatprep.subr.bf16.mxu0 %v2203_v39  ;;  %v2237_v39 = vld [vmem:[#allocation5 + $0x110] ss:$8 sps:$4 sm:$0xff]  }
 0x1c5   :  { %1592 = vmatpush1.bf16.msra.mxu0 %v2201_v62  ;;  %v2242_v62 = vld [vmem:[#allocation5 + $0x124] ss:$8 sps:$4 sm:$0xff]  }
 0x1c6   :  { %1593 = vmatprep.subr.bf16.mxu0 %v2206_v63  ;;  %v2240_v63 = vld [vmem:[#allocation5 + $0x120] ss:$8 sps:$4 sm:$0xff]  }
 0x1c9   :  { %1594 = vmatpush1.bf16.msra.mxu0 %v2204_v1  ;;  %v2245_v1 = vld [vmem:[#allocation5 + $0x134] ss:$8 sps:$4 sm:$0xff]  }
 0x1ca   :  { %1595 = vmatprep.subr.bf16.mxu0 %v2209_v2  ;;  %v2243_v2 = vld [vmem:[#allocation5 + $0x130] ss:$8 sps:$4 sm:$0xff]  }
 0x1cd   :  { %1596 = vmatpush1.bf16.msra.mxu0 %v2207_v3  ;;  %v2248_v3 = vld [vmem:[#allocation5 + $0x144] ss:$8 sps:$4 sm:$0xff]  }
 0x1ce   :  { %1597 = vmatprep.subr.bf16.mxu0 %v2212_v4  ;;  %v2246_v4 = vld [vmem:[#allocation5 + $0x140] ss:$8 sps:$4 sm:$0xff]  }
 0x1d1   :  { %1598 = vmatpush1.bf16.msra.mxu0 %v2210_v5  ;;  %v2251_v5 = vld [vmem:[#allocation5 + $0x154] ss:$8 sps:$4 sm:$0xff]  }
 0x1d2   :  { %1599 = vmatprep.subr.bf16.mxu0 %v2215_v6  ;;  %v2249_v6 = vld [vmem:[#allocation5 + $0x150] ss:$8 sps:$4 sm:$0xff]  }
 0x1d5   :  { %1600 = vmatpush1.bf16.msra.mxu0 %v2213_v7  ;;  %v2254_v7 = vld [vmem:[#allocation5 + $0x164] ss:$8 sps:$4 sm:$0xff]  }
 0x1d6   :  { %1601 = vmatprep.subr.bf16.mxu0 %v2218_v8  ;;  %v2252_v8 = vld [vmem:[#allocation5 + $0x160] ss:$8 sps:$4 sm:$0xff]  }
 0x1d9   :  { %1602 = vmatpush1.bf16.msra.mxu0 %v2216_v9  ;;  %v2257_v9 = vld [vmem:[#allocation5 + $0x174] ss:$8 sps:$4 sm:$0xff]  }
 0x1da   :  { %1603 = vmatprep.subr.bf16.mxu0 %v2221_v10  ;;  %v2255_v10 = vld [vmem:[#allocation5 + $0x170] ss:$8 sps:$4 sm:$0xff]  }
 0x1dd   :  { %1604 = vmatpush1.bf16.msra.mxu0 %v2219_v11  ;;  %v2260_v11 = vld [vmem:[#allocation5 + $0x184] ss:$8 sps:$4 sm:$0xff]  }
 0x1de   :  { %1605 = vmatprep.subr.bf16.mxu0 %v2224_v12  ;;  %v2258_v12 = vld [vmem:[#allocation5 + $0x180] ss:$8 sps:$4 sm:$0xff]  }
 0x1e1   :  { %1606 = vmatpush1.bf16.msra.mxu0 %v2222_v13  ;;  %v2263_v13 = vld [vmem:[#allocation5 + $0x194] ss:$8 sps:$4 sm:$0xff]  }
 0x1e2   :  { %1607 = vmatprep.subr.bf16.mxu0 %v2227_v14  ;;  %v2261_v14 = vld [vmem:[#allocation5 + $0x190] ss:$8 sps:$4 sm:$0xff]  }
 0x1e5   :  { %1608 = vmatpush1.bf16.msra.mxu0 %v2225_v15  ;;  %v2266_v15 = vld [vmem:[#allocation5 + $0x1a4] ss:$8 sps:$4 sm:$0xff]  }
 0x1e6   :  { %1609 = vmatprep.subr.bf16.mxu0 %v2230_v41  ;;  %v2293_v41 = vld [vmem:[#allocation7 + $0x34] ss:$8 sps:$4 sm:$0xff]  }
 0x1e9   :  { %1610 = vmatpush1.bf16.msra.mxu0 %v2228_v42  ;;  %v2291_v42 = vld [vmem:[#allocation7 + $0x30] ss:$8 sps:$4 sm:$0xff]  }
 0x1ea   :  { %1611 = vmatprep.subr.bf16.mxu0 %v2233_v43  ;;  %v2296_v43 = vld [vmem:[#allocation7 + $0x44] ss:$8 sps:$4 sm:$0xff]  }
 0x202   :  { %v2592_v44 = vpop.f32.mrb[12].mxu1  ;;  %v2594_v45 = vpop.f32.mrb[0].mxu0 }
 0x203   :  { %v2596_v46 = vpop.f32.mrb[13].mxu1  ;;  %v2598_v47 = vpop.f32.mrb[1].mxu0  ;;  %v1667_v27 = vrot.slane %v2594_v45, 6  ;;  %v2236_v45 = vld [vmem:[#allocation5 + $0x104] ss:$8 sps:$4 sm:$0xff]  }
 0x204   :  { %v995_v48 = vpop.f32.mrb[14].mxu1  ;;  %v1118_v49 = vpop.f32.mrb[2].mxu0  ;;  %v1670_v29 = vrot.slane %v2598_v47, 5 }
 0x205   :  { %v996_v50 = vpop.f32.mrb[15].mxu1  ;;  %v1119_v51 = vpop.f32.mrb[3].mxu0 }
 0x206   :  { %v2614_v50 = vpop.permute.xlu1 %1134 }
 0x242   :  { %v1032_v16 = vpop.f32.mrb[16].mxu1 }
 0x243   :  { %v1123_v17 = vpack.c.bf16 %v1032_v16, %v2592_v44  ;;  %v1034_v18 = vpop.f32.mrb[17].mxu1  ;;  %v2231_v44 = vld [vmem:[#allocation5 + $0xf0] ss:$8 sps:$4 sm:$0xff]   ;;  %v2264_v16 = vld [vmem:[#allocation5 + $0x1a0] ss:$8 sps:$4 sm:$0xff]  }
 0x244   :  { %v1124_v19 = vpack.c.bf16 %v1034_v18, %v2596_v46  ;;  %v1036_v20 = vpop.f32.mrb[18].mxu1  ;;  %1612 = vmatpush1.bf16.msra.mxu0 %v2231_v44  ;;  %v1130_v46 = vpop.permute.xlu0 %1129  ;;  %v2267_v18 = vld [vmem:[#allocation5 + $0x1b0] ss:$8 sps:$4 sm:$0xff]   ;;  %v2294_v44 = vld [vmem:[#allocation7 + $0x40] ss:$8 sps:$4 sm:$0xff]  }
 0x245   :  { %v1037_v21 = vpop.f32.mrb[19].mxu1  ;;  %1622 = vmatprep.subr.bf16.mxu0 %v2236_v45  ;;  %v2270_v20 = vld [vmem:[#allocation5 + $0x1c0] ss:$8 sps:$4 sm:$0xff]   ;;  %v2299_v45 = vld [vmem:[#allocation7 + $0x54] ss:$8 sps:$4 sm:$0xff]  }
 0x246   :  { %1146 = vmatprep.subr.bf16.mxu1 %v1124_v19  ;;  %v2272_v19 = vld [vmem:[#allocation5 + $0x1c4] ss:$8 sps:$4 sm:$0xff]   ;;  %v2275_v21 = vld [vmem:[#allocation5 + $0x1d4] ss:$8 sps:$4 sm:$0xff]  }
 0x247   :  { %1147 = vmatpush1.bf16.msra.mxu1 %v1123_v17  ;;  %v2269_v17 = vld [vmem:[#allocation5 + $0x1b4] ss:$8 sps:$4 sm:$0xff]  }
 0x24a   :  { %2070 = vmatmul.mubr.msk.bf16.vlgmr.msra.gmra.mrb[24].mxu1 %vm1142_vm1, %v2185_v22  ;;  %v2273_v22 = vld [vmem:[#allocation5 + $0x1d0] ss:$8 sps:$4 sm:$0xff]  }
 0x24b   :  { %1882 = vmatprep.mubr.bf16.mxu1 %v2432_v0 }
 0x282   :  { %v1073_v23 = vpop.f32.mrb[20].mxu1 }
 0x283   :  { %v1075_v24 = vpop.f32.mrb[21].mxu1 }
 0x284   :  { %v1664_v25 = vrot.slane %v1075_v24, 7  ;;  %v1077_v26 = vpop.f32.mrb[22].mxu1  ;;  %v2276_v24 = vld [vmem:[#allocation5 + $0x1e0] ss:$8 sps:$4 sm:$0xff]  }
 0x285   :  { %v1078_v28 = vpop.f32.mrb[23].mxu1  ;;  %v2281_v26 = vld [vmem:[#allocation5 + $0x1f4] ss:$8 sps:$4 sm:$0xff]  }
 0x286   :  { %v1673_v30 = vsel %vm1672_vm2, %v1073_v23, %v1664_v25 }
 0x287   :  { %v1675_v31 = vsel %vm1674_vm3, %v1673_v30, %v1667_v27  ;;  %v2282_v30 = vld [vmem:[#allocation7] ss:$8 sps:$4 sm:$0xff]  }
 0x288   :  { %v1677_v32 = vsel %vm1676_vm4, %v1675_v31, %v1670_v29 }
 0x289   :  { %v1679_v33 = vsel %vm1678_vm5, %v1677_v32, %v1073_v23  ;;  %v2278_v23 = vld [vmem:[#allocation5 + $0x1e4] ss:$8 sps:$4 sm:$0xff]   ;;  %v2287_v32 = vld [vmem:[#allocation7 + $0x14] ss:$8 sps:$4 sm:$0xff]  }
 0x28a   :  { %v1681_v35 = vsel %vm1680_vm6, %v1679_v33, %v1664_v25  ;;  %v2285_v33 = vld [vmem:[#allocation7 + $0x10] ss:$8 sps:$4 sm:$0xff]  }
 0x28b   :  { %v1683_v37 = vsel %vm1682_vm7, %v1681_v35, %v1667_v27  ;;  %v2279_v27 = vld [vmem:[#allocation5 + $0x1f0] ss:$8 sps:$4 sm:$0xff]   ;;  %v2290_v35 = vld [vmem:[#allocation7 + $0x24] ss:$8 sps:$4 sm:$0xff]  }
 0x28c   :  { %v2612_v38 = vsel %vm1684_vm8, %v1683_v37, %v1670_v29  ;;  %v2284_v29 = vld [vmem:[#allocation7 + $0x4] ss:$8 sps:$4 sm:$0xff]   ;;  %v2288_v37 = vld [vmem:[#allocation7 + $0x20] ss:$8 sps:$4 sm:$0xff]  }
 0x31d   :  { %v1180_v47 = vpop.f32.mrb[24].mxu1 }
 0x31e   :  { %v1181_v48 = vadd.f32 %v1180_v47, %v1130_v46  ;;  %v1182_v49 = vpop.f32.mrb[25].mxu1  ;;  %v2302_v47 = vld [vmem:[#allocation7 + $0x64] ss:$8 sps:$4 sm:$0xff]  }
 0x31f   :  { %v1183_v51 = vadd.f32 %v1182_v49, %v1130_v46  ;;  %v2616_v52 = vpop.f32.mrb[26].mxu1  ;;  %v2297_v46 = vld [vmem:[#allocation7 + $0x50] ss:$8 sps:$4 sm:$0xff]   ;;  %v2305_v49 = vld [vmem:[#allocation7 + $0x74] ss:$8 sps:$4 sm:$0xff]  }
 0x320   :  { %v1189_v53 = vmax.f32 %v1181_v48, 0.0  ;;  %v1186_v40 = vpop.f32.mrb[27].mxu1  ;;  %v1185_v25 = vadd.f32 %v2616_v52, %v2614_v50  ;;  %v2300_v48 = vld [vmem:[#allocation7 + $0x60] ss:$8 sps:$4 sm:$0xff]  }
 0x321   :  { %v1190_v54 = vmax.f32 %v1183_v51, 0.0  ;;  %v1187_v55 = vadd.f32 %v1186_v40, %v2614_v50  ;;  %v2303_v51 = vld [vmem:[#allocation7 + $0x70] ss:$8 sps:$4 sm:$0xff]  }
 0x322   :  { %v1193_v59 = vpack.c.bf16 %v1189_v53, %v1189_v53  ;;  %v1191_v28 = vmax.f32 %v1185_v25, 0.0 }
 0x323   :  { %v1194_v56 = vpack.c.bf16 %v1190_v54, %v1190_v54  ;;  %v1192_v57 = vmax.f32 %v1187_v55, 0.0 }
 0x324   :  { %v1195_v31 = vpack.c.bf16 %v1191_v28, %v1191_v28 }
 0x325   :  { %v1196_v61 = vpack.c.bf16 %v1192_v57, %v1192_v57  ;;  %1613 = vmatprep.mubr.bf16.mxu0 %v1194_v56 }
 0x326   :  { %1614 = vmatmul.mubr.bf16.vlgmr.msra.gmra.mrb[4].mxu0 %v1193_v59 }
 0x327   :  { %1623 = vmatpush1.bf16.msra.mxu0 %v2234_v58  ;;  %1654 = vmatprep.mubr.bf16.mxu0 %v1196_v61 }
 0x328   :  { %1624 = vmatprep.subr.bf16.mxu0 %v2239_v60 }
 0x32b   :  { %1625 = vmatpush1.bf16.msra.mxu0 %v2237_v39 }
 0x32c   :  { %1626 = vmatprep.subr.bf16.mxu0 %v2242_v62 }
 0x32f   :  { %1627 = vmatpush1.bf16.msra.mxu0 %v2240_v63 }
 0x330   :  { %1628 = vmatprep.subr.bf16.mxu0 %v2245_v1 }
 0x333   :  { %1629 = vmatpush1.bf16.msra.mxu0 %v2243_v2 }
 0x334   :  { %1630 = vmatprep.subr.bf16.mxu0 %v2248_v3 }
 0x337   :  { %1631 = vmatpush1.bf16.msra.mxu0 %v2246_v4 }
 0x338   :  { %1632 = vmatprep.subr.bf16.mxu0 %v2251_v5 }
 0x33b   :  { %1633 = vmatpush1.bf16.msra.mxu0 %v2249_v6 }
 0x33c   :  { %1634 = vmatprep.subr.bf16.mxu0 %v2254_v7 }
 0x33f   :  { %1635 = vmatpush1.bf16.msra.mxu0 %v2252_v8 }
 0x340   :  { %1636 = vmatprep.subr.bf16.mxu0 %v2257_v9 }
 0x343   :  { %1637 = vmatpush1.bf16.msra.mxu0 %v2255_v10 }
 0x344   :  { %1638 = vmatprep.subr.bf16.mxu0 %v2260_v11 }
 0x347   :  { %1639 = vmatpush1.bf16.msra.mxu0 %v2258_v12 }
 0x348   :  { %1640 = vmatprep.subr.bf16.mxu0 %v2263_v13 }
 0x34b   :  { %1641 = vmatpush1.bf16.msra.mxu0 %v2261_v14 }
 0x34c   :  { %1642 = vmatprep.subr.bf16.mxu0 %v2266_v15 }
 0x34f   :  { %1643 = vmatpush1.bf16.msra.mxu0 %v2264_v16 }
 0x350   :  { %1644 = vmatprep.subr.bf16.mxu0 %v2269_v17 }
 0x353   :  { %1645 = vmatpush1.bf16.msra.mxu0 %v2267_v18 }
 0x354   :  { %1646 = vmatprep.subr.bf16.mxu0 %v2272_v19 }
 0x357   :  { %1647 = vmatpush1.bf16.msra.mxu0 %v2270_v20 }
 0x358   :  { %1648 = vmatprep.subr.bf16.mxu0 %v2275_v21 }
 0x35b   :  { %1649 = vmatpush1.bf16.msra.mxu0 %v2273_v22 }
 0x35c   :  { %1650 = vmatprep.subr.bf16.mxu0 %v2278_v23 }
 0x35f   :  { %1651 = vmatpush1.bf16.msra.mxu0 %v2276_v24 }
 0x360   :  { %1652 = vmatprep.subr.bf16.mxu0 %v2281_v26 }
 0x363   :  { %1653 = vmatpush1.bf16.msra.mxu0 %v2279_v27 }
 0x364   :  { %1786 = vmatprep.subr.bf16.mxu0 %v2284_v29 }
 0x366   :  { %1655 = vmatmul.mubr.bf16.vlgmr.msra.gmra.mrb[4].mxu0 %v1195_v31 }
 0x367   :  { %1787 = vmatpush1.bf16.msra.mxu0 %v2282_v30  ;;  %1818 = vmatprep.mubr.bf16.mxu0 %v2432_v0  ;;  %v1686_v0 = vld [vmem:[%s2663_s6] sm:$0xff] }
 0x368   :  { %1788 = vmatprep.subr.bf16.mxu0 %v2287_v32  ;;  %v1687_v50 = vadd.f32 %v1686_v0, %v2612_v38  ;;  %v2306_v38 = vld [vmem:[%s2661_s4 + $0x20] sm:$0xff]  }
 0x36a   :  { %v1688_v52 = vmax.f32 %v1687_v50, 0.0 }
 0x36b   :  { %1789 = vmatpush1.bf16.msra.mxu0 %v2285_v33 }
 0x36c   :  { %1790 = vmatprep.subr.bf16.mxu0 %v2290_v35  ;;  %v1689_v53 = vpack.c.bf16 %v1688_v52, %v1688_v52 }
 0x36f   :  { %1791 = vmatpush1.bf16.msra.mxu0 %v2288_v37 }
 0x370   :  { %1792 = vmatprep.subr.bf16.mxu0 %v2293_v41 }
 0x373   :  { %1793 = vmatpush1.bf16.msra.mxu0 %v2291_v42 }
 0x374   :  { %1794 = vmatprep.subr.bf16.mxu0 %v2296_v43 }
 0x377   :  { %1795 = vmatpush1.bf16.msra.mxu0 %v2294_v44 }
 0x378   :  { %1796 = vmatprep.subr.bf16.mxu0 %v2299_v45 }
 0x37b   :  { %1797 = vmatpush1.bf16.msra.mxu0 %v2297_v46 }
 0x37c   :  { %1798 = vmatprep.subr.bf16.mxu0 %v2302_v47 }
 0x37f   :  { %1799 = vmatpush1.bf16.msra.mxu0 %v2300_v48 }
 0x380   :  { %1800 = vmatprep.subr.bf16.mxu0 %v2305_v49 }
 0x383   :  { %1801 = vmatpush1.bf16.msra.mxu0 %v2303_v51 }
 0x386   :  { %1819 = vmatmul.mubr.bf16.vlgmr.msra.gmra.mrb[4].mxu0 %v1689_v53 }
 0x459   :  { %v1820_v40 = vpop.f32.mrb[4].mxu0 }
 0x45a   :  { %v2154_v54 = vadd.f32 %v1820_v40, %v2571_v34  ;;  %v1822_v55 = vpop.f32.mrb[5].mxu0 }
 0x45b   :  { %v2155_v56 = vadd.f32 %v1822_v55, %v2573_v36  ;;  %v1824_v57 = vpop.f32.mrb[6].mxu0 }
 0x45c   :  { %v1831_v58 = vpack.c.bf16 %v2154_v54, %v2154_v54  ;;  %v1825_v59 = vpop.f32.mrb[7].mxu0 }
 0x45d   :  { %v1832_v60 = vpack.c.bf16 %v2155_v56, %v2155_v56 }
 0x45e   :  { %v1845_v61 = vsel %vm1678_vm5, %v1831_v58, 0 }
 0x45f   :  { %2152 = vmatprep.subr.msk.bf16.mxu1 %vm1678_vm5, %v1832_v60 }
 0x460   :  { %1851 = vmatpush1.bf16.msra.mxu1 %v1845_v61 }
 0x463   :  { %2153 = vmatmul.mubr.msk.bf16.vlgmr.msra.gmra.mrb[4].mxu1 %vm1840_vm9, %v2306_v38 }
 0x464   :  { %2384 = shalt.err (!%p2381_p0)
}
 0x465   :  { %s2385_s30 = scalar_lea.hbm %s2664_s7, 512 }
 0x466   :  { %p2386_p1 = scmp.ne.s32.totalorder %s2664_s7, %s2385_s30  ;;  %p2389_p2 = scmp.lt.u32.totalorder %s2385_s30, %s2664_s7 }
 0x468   :  { %p2391_p3 = pnand %p2389_p2, %p2386_p1 }
 0x46a   :  { %2394 = shalt.err (!%p2391_p3)
}
 0x46b   :  { %s2434_s12 = smov 256   ;;  %s2435_s13 = smov 16  }
 0x46c   :  { %1912 = dma.vmem_to_hbm [thread:$0]  %s1907_s27, 512, %s2664_s7, [#allocation4], %s2434_s12, %s2434_s12, %s2435_s13  }
 0x46d   :  { %s2436_s18 = smov [#allocation9]  }
 0x46e   :  { %s1918_s19 = sshll.u32 %s2436_s18, 4  ;;  %s1919_s19 = int_to_ptr.vmem [resolvable:$true] %s1918_s19 }
 0x46f   :  { %s2395_s21 = scalar_lea.vmem %s1919_s19, 512  ;;  %p2400_p5 = scmp.lt.s32.totalorder %s1919_s19, %s1919_s19 }
 0x470   :  { %p2396_p4 = scmp.ne.s32.totalorder %s1919_s19, %s2395_s21  ;;  %p2401_p6 = scmp.lt.s32.totalorder %s2395_s21, %s2395_s21 }
 0x472   :  { %p2402_p7 = por %p2401_p6, %p2400_p5 }
 0x474   :  { %p2403_p8 = pnand %p2402_p7, %p2396_p4 }
 0x536   :  { %v1884_v34 = vpop.f32.mrb[4].mxu1 }
 0x537   :  { %1897 = vst [vmem:[#allocation9] sm:$0xff] %v1884_v34  ;;  %v1886_v36 = vpop.f32.mrb[5].mxu1 }
 0x538   :  { %1898 = vst [vmem:[#allocation9 + $0x8] sm:$0xff] %v1886_v36  ;;  %v1888_v39 = vpop.f32.mrb[6].mxu1 }
 0x539   :  { %1899 = vst [vmem:[#allocation9 + $0x10] sm:$0xff] %v1888_v39  ;;  %v1890_v62 = vpop.f32.mrb[7].mxu1 }
 0x53a   :  { %1900 = vst [vmem:[#allocation9 + $0x18] sm:$0xff] %v1890_v62 }
 0x53b   :  { %2406 = shalt.err (!%p2403_p8)
}
 0x53c   :  { %s2407_s22 = scalar_lea.hbm %s2665_s8, 512 }
 0x53d   :  { %p2408_p9 = scmp.ne.s32.totalorder %s2665_s8, %s2407_s22  ;;  %p2411_p10 = scmp.lt.u32.totalorder %s2407_s22, %s2665_s8 }
 0x53f   :  { %p2413_p11 = pnand %p2411_p10, %p2408_p9 }
 0x541   :  { %2416 = shalt.err (!%p2413_p11)
}
 0x542   :  { %1924 = dma.vmem_to_hbm [thread:$0]  %s1919_s19, 512, %s2665_s8, [#allocation10], %s2434_s12, %s2434_s12, %s2435_s13  }
 0x543   :  { %2421 = dma.done.wait [#allocation4], 512  }
 0x544   :  { %2422 = vsyncadd [#allocation4], 4294966784 }
 0x545   :  { %2423 = dma.done.wait [#allocation10], 512  }
 0x546   :  { %2424 = vsyncadd [#allocation10], 4294966784 }
 0x547   :  { %1931 = vsyncpa [#allocation3], 1 }
 0x548   :  { %1932 = vsyncpa [#allocation6], 1 }
 0x549   :  { %1933 = vsyncpa [#allocation4], 1 }
 0x54a   :  { %1934 = vsyncpa [#allocation10], 1 }

</bundles_post_ra>
